<compile_context>
chip_gen: v7x
topology: tpu7x:2x2x1
jax: 0.10.0
libtpu: 0.0.40
codegen_flags: <defaults>
</compile_context>

<pallas_src>
import functools

import numpy as np
import jax
import jax.numpy as jnp
from jax import lax
from jax.experimental import pallas as pl
from jax.experimental.pallas import tpu as pltpu

LANE = 128  # lane width the in-kernel (n, t) axis is padded up to


# --------------------------------------------------------------------------- #
# Skeleton neighbourhood mask (graph distance <= neighbor_dist_thresh).
# --------------------------------------------------------------------------- #
def build_neighbor_mask(topology, dist_thresh):
    J = len(topology)
    dist = np.full((J, J), 1e9, dtype=np.float64)
    np.fill_diagonal(dist, 0.0)
    for j, p in enumerate(topology):
        if p != j and 0 <= p < J:
            dist[j, p] = dist[p, j] = 1.0
    for k in range(J):                                    # Floyd-Warshall
        dist = np.minimum(dist, dist[:, k:k + 1] + dist[k:k + 1, :])
    # TODO(synk): exact ee_id (end-effector) handling inside SkeletonConvolution
    # is not in the provided source; the mask uses pure graph-distance threshold.
    return (dist <= dist_thresh).astype(np.float32)


# --------------------------------------------------------------------------- #
# The fused kernel.  In-kernel layout: rows = (joint, channel), lanes = (n, t)
# padded to L (multiple of 128).
#   x_st  : [J*Cin, L]          stacked block input
#   w1b   : [J, Cout, Cin]      conv1by1 weight, joint-batched
#   wst1  : [J*H,   kt*J*Cin]   neighbour-masked, joint-stacked conv1 weights
#   wst2  : [J*Cout, kt*J*H]    neighbour-masked, joint-stacked conv2 weights
#   b*/g*/be* : [C, 1]          bias / BN affine columns
#   tmask : [kt, 1, L]          per-tap temporal-boundary validity masks
#   vmask : [1, L]              lane-validity mask for BN statistics
# --------------------------------------------------------------------------- #
def _make_dec_block_kernel(*, J, Cin, Cout, H, NT, L, kt, eps=1e-5, slope=0.01):
    pad = kt // 2
    padded = (L != NT)
    inv_cnt = 1.0 / float(J * NT)        # BN batch-statistics element count

    def kernel(x_ref, w1b_ref, b1x1_ref, wst1_ref, bc1_ref, wst2_ref, bc2_ref,
               g1_ref, be1_ref, g2_ref, be2_ref, tmask_ref, vmask_ref, o_ref):
        x_st = x_ref[...]                                   # [J*Cin, L]

        # kt temporal taps via lane rotation (XLU) + precomputed boundary masks.
        # Resulting rows are ordered (dt, joint, channel) to match the stacked
        # weight columns, so each conv is a single MXU contraction.
        def taps(v):
            pieces = []
            for dt in range(kt):
                off = dt - pad
                if off == 0:
                    pieces.append(v)
                else:
                    sh = (-off) % L           # roll: out[l] = v[l + off]
                    pieces.append(pltpu.roll(v, shift=sh, axis=1)
                                  * tmask_ref[dt])
            return jnp.concatenate(pieces, axis=0)

        # One-pass training-mode BatchNorm (biased var) on the [J, C, L] view.
        vmask = vmask_ref[...].reshape(1, 1, L)
        def bn(v, C, g_ref, be_ref):
            vm = v * vmask if padded else v        # exclude padded lanes
            s = jnp.sum(jnp.sum(vm, axis=2, keepdims=True),
                        axis=0, keepdims=True)                     # [1, C, 1]
            q = jnp.sum(jnp.sum(vm * vm, axis=2, keepdims=True),
                        axis=0, keepdims=True)                     # [1, C, 1]
            mean = s * inv_cnt
            var = q * inv_cnt - mean * mean                        # biased var
            scale = g_ref[...].reshape(1, C, 1) * lax.rsqrt(var + eps)
            shift = be_ref[...].reshape(1, C, 1) - mean * scale
            return v * scale + shift

        # ---- conv1by1 identity: per-joint batched [Cout,Cin] x [Cin,L] -------
        xj = x_st.reshape(J, Cin, L)
        identity = jnp.einsum("joc,jcl->jol", w1b_ref[...], xj,
                              preferred_element_type=jnp.float32)
        identity = identity + b1x1_ref[...].reshape(1, Cout, 1)   # [J, Cout, L]

        # ---- conv1: ONE MXU contraction over K = kt*J*Cin --------------------
        xcol = taps(x_st)                                   # [kt*J*Cin, L]
        out1 = jnp.dot(wst1_ref[...], xcol, preferred_element_type=jnp.float32)
        out1 = out1.reshape(J, H, L) + bc1_ref[...].reshape(1, H, 1)

        y1 = bn(out1, H, g1_ref, be1_ref)
        y1 = jnp.where(y1 >= 0, y1, slope * y1)             # LeakyReLU(0.01)
        y1 = y1.reshape(J * H, L)

        # ---- conv2: all kt taps folded into ONE K = kt*J*H matmul ------------
        ycol = taps(y1)                                     # [kt*J*H, L]
        out2 = jnp.dot(wst2_ref[...], ycol, preferred_element_type=jnp.float32)
        out2 = out2.reshape(J, Cout, L) + bc2_ref[...].reshape(1, Cout, 1)

        y2 = bn(out2, Cout, g2_ref, be2_ref)

        # ---- bn2 + residual, dense-lane store ---------------------------------
        o_ref[...] = (y2 + identity).reshape(J * Cout, L)

    return kernel


# --------------------------------------------------------------------------- #
# Once-per-module weight preparation (hoisted out of the per-step forward).
# --------------------------------------------------------------------------- #
def prepare_block_params(params, mask_np, kt):
    mask = jnp.asarray(mask_np, jnp.float32)                 # [J, J]
    J = mask.shape[0]
    wc1 = jnp.asarray(params["wc1"], jnp.float32)            # [H, Cin, J, kt]
    wc2 = jnp.asarray(params["wc2"], jnp.float32)            # [Cout, H, J, kt]
    H, Cin = wc1.shape[0], wc1.shape[1]
    Cout = wc2.shape[0]

    # conv1: rows (j_out, h), cols (dt, j_in, ci)
    m1 = wc1[None] * mask[:, None, None, :, None]            # [J,H,Cin,J,kt]
    wst1 = m1.transpose(0, 1, 4, 3, 2).reshape(J * H, kt * J * Cin)
    # conv2: rows (j_out, co), cols (dt, j_in, h)
    m2 = wc2[None] * mask[:, None, None, :, None]            # [J,Cout,H,J,kt]
    wst2 = m2.transpose(0, 1, 4, 3, 2).reshape(J * Cout, kt * J * H)
    # conv1by1 weight, joint-batched so the in-kernel dot_general has a real
    # batch dimension (no block-diagonal zero padding of K).
    w1b = jnp.broadcast_to(jnp.asarray(params["w1x1"], jnp.float32)[None],
                           (J, Cout, Cin))

    col = lambda p: jnp.asarray(p, jnp.float32).reshape(-1, 1)
    return dict(wst1=wst1, wst2=wst2, w1b=w1b,
                b1x1=col(params["b1x1"]), bc1=col(params["bc1"]),
                bc2=col(params["bc2"]),
                g1=col(params["g1"]), be1=col(params["be1"]),
                g2=col(params["g2"]), be2=col(params["be2"]))


# --------------------------------------------------------------------------- #
# DecBasicBlock.forward
# --------------------------------------------------------------------------- #
def dec_basic_block(x, s_latent, prep, *, expand_nums, J, Cin, Cout, H, kt):
    # SkeletonUnPool (joint repeat_interleave) + channel concat (cheap XLA glue)
    idx = np.repeat(np.arange(len(expand_nums)), expand_nums)
    u0 = jnp.concatenate([x[:, :, idx, :], s_latent], axis=1)   # [N, Cin, J, T]
    N, _, _, T = u0.shape
    NT = N * T
    L = ((NT + LANE - 1) // LANE) * LANE      # dense lane axis (multiple of 128)
    pad = kt // 2

    # canonical stacked layout: rows (j, ci) on sublanes, (n, t) on lanes
    x_st = u0.transpose(2, 1, 0, 3).reshape(J * Cin, NT)
    if L != NT:
        x_st = jnp.pad(x_st, ((0, 0), (0, L - NT)))

    # temporal-tap / lane-validity masks: tiny compile-time constants
    lane = np.arange(L)
    t_of = lane % T
    tmask = np.zeros((kt, 1, L), np.float32)
    for dt in range(kt):
        off = dt - pad
        tmask[dt, 0] = ((t_of + off >= 0) & (t_of + off <= T - 1)
                        & (lane < NT)).astype(np.float32)
    vmask = (lane < NT).astype(np.float32).reshape(1, L)

    kernel = _make_dec_block_kernel(J=J, Cin=Cin, Cout=Cout, H=H,
                                    NT=NT, L=L, kt=kt)
    # grid=(): whole working set (<1 MB) is VMEM-resident.  For production N*T,
    # tile the lane axis with a grid marked "parallel" (uses both v7x TCs) and
    # switch BatchNorm to accumulate/finalize over that axis.
    out_st = pl.pallas_call(
        kernel,
        out_shape=jax.ShapeDtypeStruct((J * Cout, L), jnp.float32),
        compiler_params=pltpu.CompilerParams(vmem_limit_bytes=32 * 1024 * 1024),
    )(x_st, prep["w1b"], prep["b1x1"], prep["wst1"], prep["bc1"],
      prep["wst2"], prep["bc2"], prep["g1"], prep["be1"], prep["g2"],
      prep["be2"], jnp.asarray(tmask), jnp.asarray(vmask))

    # stacked [(j, co), (n, t)] -> [N, Cout, J, T]
    return out_st[:, :NT].reshape(J, Cout, N, T).transpose(2, 1, 0, 3)


# --------------------------------------------------------------------------- #
# Pure-JAX (XLA) reference of the same forward semantics, for validation.
# --------------------------------------------------------------------------- #
def reference_forward(x, s_latent, params, expand_nums, mask_np, kt):
    mask = jnp.asarray(mask_np, jnp.float32)
    idx = np.repeat(np.arange(len(expand_nums)), expand_nums)
    u = jnp.concatenate([x[:, :, idx, :], s_latent], axis=1)
    pad = kt // 2
    T = u.shape[-1]

    def skel_conv(v, w, b):
        vp = jnp.pad(v, ((0, 0), (0, 0), (0, 0), (pad, pad)))
        taps = jnp.stack([vp[..., dt:dt + T] for dt in range(kt)], axis=-1)
        out = jnp.einsum("ocid,ji,ncitd->nojt", w, mask, taps,
                         precision=lax.Precision.HIGHEST)
        return out + b[None, :, None, None]

    def bn(v, g, be):
        mean = jnp.mean(v, axis=(0, 2, 3), keepdims=True)
        var = jnp.mean((v - mean) ** 2, axis=(0, 2, 3), keepdims=True)
        return (g[None, :, None, None] * (v - mean) * lax.rsqrt(var + 1e-5)
                + be[None, :, None, None])

    identity = (jnp.einsum("oc,ncjt->nojt", params["w1x1"], u,
                           precision=lax.Precision.HIGHEST)
                + params["b1x1"][None, :, None, None])
    o = skel_conv(u, params["wc1"], params["bc1"])
    o = bn(o, params["g1"], params["be1"])
    o = jnp.where(o >= 0, o, 0.01 * o)
    o = skel_conv(o, params["wc2"], params["bc2"])
    o = bn(o, params["g2"], params["be2"])
    return o + identity


if __name__ == "__main__":
    # module hyper-parameters (mirrors DecBasicBlock.__init__)
    topology = [0, 0, 1, 2, 0, 4, 5]              # parent list, J = 7 joints
    dynamic_kernel_size = 3                       # args.dynamic_kernel_size
    neighbor_dist_thresh = 2                      # args.neighbor_dist_thresh
    ee_id = [3, 6]                                # end effectors (see TODO above)
    expand_nums = [2, 2, 2, 1]                    # SkeletonUnPool: 4 -> 7 joints
    in_channel, out_channel = 16, 16
    hidden = out_channel // 2
    J, kt = len(topology), dynamic_kernel_size
    N, T = 2, 16
    cx = 8                                        # channels carried by x

    key = jax.random.PRNGKey(0)
    ks = jax.random.split(key, 8)
    params = dict(
        w1x1=0.1 * jax.random.normal(ks[0], (out_channel, in_channel), jnp.float32),
        b1x1=0.1 * jax.random.normal(ks[1], (out_channel,), jnp.float32),
        wc1=0.1 * jax.random.normal(ks[2], (hidden, in_channel, J, kt), jnp.float32),
        bc1=0.1 * jax.random.normal(ks[3], (hidden,), jnp.float32),
        wc2=0.1 * jax.random.normal(ks[4], (out_channel, hidden, J, kt), jnp.float32),
        bc2=0.1 * jax.random.normal(ks[5], (out_channel,), jnp.float32),
        g1=jnp.ones((hidden,), jnp.float32), be1=jnp.zeros((hidden,), jnp.float32),
        g2=jnp.ones((out_channel,), jnp.float32), be2=jnp.zeros((out_channel,), jnp.float32),
    )

    x = jax.random.normal(ks[6], (N, cx, len(expand_nums), T), jnp.float32)
    s_latent = jax.random.normal(ks[7], (N, in_channel - cx, J, T), jnp.float32)
    mask = build_neighbor_mask(topology, neighbor_dist_thresh)

    # once-per-module preparation (hoisted out of the jitted forward)
    prep = prepare_block_params(params, mask, kt)
    # TODO(synk): eval-mode BatchNorm (running_mean/var usage + update) is not
    # implemented; this forward reproduces training-mode batch statistics.

    fwd = jax.jit(functools.partial(
        dec_basic_block, expand_nums=expand_nums,
        J=J, Cin=in_channel, Cout=out_channel, H=hidden, kt=kt))
    y = jax.block_until_ready(fwd(x, s_latent, prep))

    assert y.shape == (N, out_channel, J, T), y.shape
    assert bool(jnp.all(jnp.isfinite(y)))

    # Numeric check against the pure-JAX reference (loose bound: tolerates MXU
    # vs HIGHEST-precision rounding, still catches any layout/indexing bug).
    y_ref = reference_forward(x, s_latent, params, expand_nums, mask, kt)
    max_err = float(jnp.max(jnp.abs(y - y_ref)))
    assert max_err < 1e-1, f"mismatch vs reference: max |diff| = {max_err}"

    print("KERNEL_OK")
</pallas_src>

<mosaic_0001>
module attributes {stable_mosaic.version = 11 : i64} {
  func.func @kernel(%arg0: memref<112x128xf32, #tpu.memory_space<vmem>>, %arg1: memref<7x16x16xf32, #tpu.memory_space<vmem>>, %arg2: memref<16x1xf32, #tpu.memory_space<vmem>>, %arg3: memref<56x336xf32, #tpu.memory_space<vmem>>, %arg4: memref<8x1xf32, #tpu.memory_space<vmem>>, %arg5: memref<112x168xf32, #tpu.memory_space<vmem>>, %arg6: memref<16x1xf32, #tpu.memory_space<vmem>>, %arg7: memref<8x1xf32, #tpu.memory_space<vmem>>, %arg8: memref<8x1xf32, #tpu.memory_space<vmem>>, %arg9: memref<16x1xf32, #tpu.memory_space<vmem>>, %arg10: memref<16x1xf32, #tpu.memory_space<vmem>>, %arg11: memref<3x1x128xf32, #tpu.memory_space<vmem>>, %arg12: memref<1x128xf32, #tpu.memory_space<vmem>>, %arg13: memref<112x128xf32, #tpu.memory_space<vmem>>) attributes {dimension_semantics = [], scalar_prefetch = 0 : i64, scratch_operands = 0 : i64, tpu.core_type = #tpu.core_type<tc>} {
    %c0 = arith.constant 0 : index
    %c0_0 = arith.constant 0 : index
    %0 = vector.load %arg0[%c0, %c0_0] : memref<112x128xf32, #tpu.memory_space<vmem>>, vector<112x128xf32>
    %c0_1 = arith.constant 0 : index
    %c0_2 = arith.constant 0 : index
    %1 = vector.load %arg12[%c0_1, %c0_2] : memref<1x128xf32, #tpu.memory_space<vmem>>, vector<1x128xf32>
    %2 = vector.shape_cast %1 : vector<1x128xf32> to vector<1x1x128xf32>
    %3 = vector.shape_cast %0 : vector<112x128xf32> to vector<7x16x128xf32>
    %c0_3 = arith.constant 0 : index
    %c0_4 = arith.constant 0 : index
    %c0_5 = arith.constant 0 : index
    %4 = vector.load %arg1[%c0_3, %c0_4, %c0_5] : memref<7x16x16xf32, #tpu.memory_space<vmem>>, vector<7x16x16xf32>
    "tpu.trace_start"() <{level = 10 : i32, message = "joc,jcl->jol"}> : () -> ()
    %cst = arith.constant dense<0.000000e+00> : vector<7x16x128xf32>
    %5 = tpu.matmul %4, %3, %cst {dimension_numbers = #tpu.dot_dimension_numbers<[2], [1], [1], [2], [0, 0, 0, 1, 1, 2], [0], [0]>} : vector<7x16x16xf32>, vector<7x16x128xf32>, vector<7x16x128xf32> -> vector<7x16x128xf32>
    "tpu.trace_stop"() : () -> ()
    %c0_6 = arith.constant 0 : index
    %c0_7 = arith.constant 0 : index
    %6 = vector.load %arg2[%c0_6, %c0_7] : memref<16x1xf32, #tpu.memory_space<vmem>>, vector<16x1xf32>
    %7 = vector.shape_cast %6 : vector<16x1xf32> to vector<1x16x1xf32>
    %8 = vector.broadcast %7 : vector<1x16x1xf32> to vector<7x16x128xf32>
    %9 = arith.addf %5, %8 : vector<7x16x128xf32>
    %c1_i32 = arith.constant 1 : i32
    %10 = tpu.dynamic_rotate %0 by %c1_i32 dim 1 : vector<112x128xf32>, i32 -> vector<112x128xf32>
    %c0_8 = arith.constant 0 : index
    %c0_9 = arith.constant 0 : index
    %c0_10 = arith.constant 0 : index
    %11 = vector.load %arg11[%c0_8, %c0_9, %c0_10] : memref<3x1x128xf32, #tpu.memory_space<vmem>>, vector<1x1x128xf32>
    %12 = vector.shape_cast %11 : vector<1x1x128xf32> to vector<1x128xf32>
    %13 = vector.broadcast %12 : vector<1x128xf32> to vector<112x128xf32>
    %14 = arith.mulf %10, %13 : vector<112x128xf32>
    %c127_i32 = arith.constant 127 : i32
    %15 = tpu.dynamic_rotate %0 by %c127_i32 dim 1 : vector<112x128xf32>, i32 -> vector<112x128xf32>
    %c2 = arith.constant 2 : index
    %c0_11 = arith.constant 0 : index
    %c0_12 = arith.constant 0 : index
    %16 = vector.load %arg11[%c2, %c0_11, %c0_12] : memref<3x1x128xf32, #tpu.memory_space<vmem>>, vector<1x1x128xf32>
    %17 = vector.shape_cast %16 : vector<1x1x128xf32> to vector<1x128xf32>
    %18 = vector.broadcast %17 : vector<1x128xf32> to vector<112x128xf32>
    %19 = arith.mulf %15, %18 : vector<112x128xf32>
    %20 = tpu.concatenate %14, %0, %19 in 0 : vector<112x128xf32>, vector<112x128xf32>, vector<112x128xf32> -> vector<336x128xf32>
    %c0_13 = arith.constant 0 : index
    %c0_14 = arith.constant 0 : index
    %21 = vector.load %arg3[%c0_13, %c0_14] : memref<56x336xf32, #tpu.memory_space<vmem>>, vector<56x336xf32>
    %cst_15 = arith.constant dense<0.000000e+00> : vector<56x128xf32>
    %22 = tpu.matmul %21, %20, %cst_15 {dimension_numbers = #tpu.dot_dimension_numbers<[1], [0], [0], [1], [0, 0, 1, 1], [], []>} : vector<56x336xf32>, vector<336x128xf32>, vector<56x128xf32> -> vector<56x128xf32>
    %23 = vector.shape_cast %22 : vector<56x128xf32> to vector<7x8x128xf32>
    %c0_16 = arith.constant 0 : index
    %c0_17 = arith.constant 0 : index
    %24 = vector.load %arg4[%c0_16, %c0_17] : memref<8x1xf32, #tpu.memory_space<vmem>>, vector<8x1xf32>
    %25 = vector.shape_cast %24 : vector<8x1xf32> to vector<1x8x1xf32>
    %26 = vector.broadcast %25 : vector<1x8x1xf32> to vector<7x8x128xf32>
    %27 = arith.addf %23, %26 : vector<7x8x128xf32>
    %28 = vector.broadcast %2 : vector<1x1x128xf32> to vector<7x8x128xf32>
    %29 = arith.mulf %27, %28 : vector<7x8x128xf32>
    %cst_18 = arith.constant dense<0.000000e+00> : vector<7x8xf32>
    %30 = vector.multi_reduction <add>, %29, %cst_18 [2] : vector<7x8x128xf32> to vector<7x8xf32>
    %31 = vector.shape_cast %30 : vector<7x8xf32> to vector<7x8x1xf32>
    %cst_19 = arith.constant dense<0.000000e+00> : vector<8x1xf32>
    %32 = vector.multi_reduction <add>, %31, %cst_19 [0] : vector<7x8x1xf32> to vector<8x1xf32>
    %33 = vector.shape_cast %32 : vector<8x1xf32> to vector<1x8x1xf32>
    %34 = arith.mulf %29, %29 : vector<7x8x128xf32>
    %cst_20 = arith.constant dense<0.000000e+00> : vector<7x8xf32>
    %35 = vector.multi_reduction <add>, %34, %cst_20 [2] : vector<7x8x128xf32> to vector<7x8xf32>
    %36 = vector.shape_cast %35 : vector<7x8xf32> to vector<7x8x1xf32>
    %cst_21 = arith.constant dense<0.000000e+00> : vector<8x1xf32>
    %37 = vector.multi_reduction <add>, %36, %cst_21 [0] : vector<7x8x1xf32> to vector<8x1xf32>
    %38 = vector.shape_cast %37 : vector<8x1xf32> to vector<1x8x1xf32>
    %cst_22 = arith.constant 0.00446428591 : f32
    %39 = vector.broadcast %cst_22 : f32 to vector<1x8x1xf32>
    %40 = arith.mulf %33, %39 : vector<1x8x1xf32>
    %cst_23 = arith.constant 0.00446428591 : f32
    %41 = vector.broadcast %cst_23 : f32 to vector<1x8x1xf32>
    %42 = arith.mulf %38, %41 : vector<1x8x1xf32>
    %43 = arith.mulf %40, %40 : vector<1x8x1xf32>
    %44 = arith.subf %42, %43 : vector<1x8x1xf32>
    %c0_24 = arith.constant 0 : index
    %c0_25 = arith.constant 0 : index
    %45 = vector.load %arg7[%c0_24, %c0_25] : memref<8x1xf32, #tpu.memory_space<vmem>>, vector<8x1xf32>
    %46 = vector.shape_cast %45 : vector<8x1xf32> to vector<1x8x1xf32>
    %cst_26 = arith.constant 9.99999974E-6 : f32
    %47 = vector.broadcast %cst_26 : f32 to vector<1x8x1xf32>
    %48 = arith.addf %44, %47 : vector<1x8x1xf32>
    %49 = math.rsqrt %48 : vector<1x8x1xf32>
    %50 = arith.mulf %46, %49 : vector<1x8x1xf32>
    %c0_27 = arith.constant 0 : index
    %c0_28 = arith.constant 0 : index
    %51 = vector.load %arg8[%c0_27, %c0_28] : memref<8x1xf32, #tpu.memory_space<vmem>>, vector<8x1xf32>
    %52 = vector.shape_cast %51 : vector<8x1xf32> to vector<1x8x1xf32>
    %53 = arith.mulf %40, %50 : vector<1x8x1xf32>
    %54 = arith.subf %52, %53 : vector<1x8x1xf32>
    %55 = vector.broadcast %50 : vector<1x8x1xf32> to vector<7x8x128xf32>
    %56 = arith.mulf %27, %55 : vector<7x8x128xf32>
    %57 = vector.broadcast %54 : vector<1x8x1xf32> to vector<7x8x128xf32>
    %58 = arith.addf %56, %57 : vector<7x8x128xf32>
    %cst_29 = arith.constant 0.000000e+00 : f32
    %59 = vector.broadcast %cst_29 : f32 to vector<7x8x128xf32>
    %60 = arith.cmpf oge, %58, %59 : vector<7x8x128xf32>
    %cst_30 = arith.constant 0.00999999977 : f32
    %61 = vector.broadcast %cst_30 : f32 to vector<7x8x128xf32>
    %62 = arith.mulf %61, %58 : vector<7x8x128xf32>
    %63 = arith.select %60, %58, %62 : vector<7x8x128xi1>, vector<7x8x128xf32>
    %64 = vector.shape_cast %63 : vector<7x8x128xf32> to vector<56x128xf32>
    %c1_i32_31 = arith.constant 1 : i32
    %65 = tpu.dynamic_rotate %64 by %c1_i32_31 dim 1 : vector<56x128xf32>, i32 -> vector<56x128xf32>
    %c0_32 = arith.constant 0 : index
    %c0_33 = arith.constant 0 : index
    %c0_34 = arith.constant 0 : index
    %66 = vector.load %arg11[%c0_32, %c0_33, %c0_34] : memref<3x1x128xf32, #tpu.memory_space<vmem>>, vector<1x1x128xf32>
    %67 = vector.shape_cast %66 : vector<1x1x128xf32> to vector<1x128xf32>
    %68 = vector.broadcast %67 : vector<1x128xf32> to vector<56x128xf32>
    %69 = arith.mulf %65, %68 : vector<56x128xf32>
    %c127_i32_35 = arith.constant 127 : i32
    %70 = tpu.dynamic_rotate %64 by %c127_i32_35 dim 1 : vector<56x128xf32>, i32 -> vector<56x128xf32>
    %c2_36 = arith.constant 2 : index
    %c0_37 = arith.constant 0 : index
    %c0_38 = arith.constant 0 : index
    %71 = vector.load %arg11[%c2_36, %c0_37, %c0_38] : memref<3x1x128xf32, #tpu.memory_space<vmem>>, vector<1x1x128xf32>
    %72 = vector.shape_cast %71 : vector<1x1x128xf32> to vector<1x128xf32>
    %73 = vector.broadcast %72 : vector<1x128xf32> to vector<56x128xf32>
    %74 = arith.mulf %70, %73 : vector<56x128xf32>
    %75 = tpu.concatenate %69, %64, %74 in 0 : vector<56x128xf32>, vector<56x128xf32>, vector<56x128xf32> -> vector<168x128xf32>
    %c0_39 = arith.constant 0 : index
    %c0_40 = arith.constant 0 : index
    %76 = vector.load %arg5[%c0_39, %c0_40] : memref<112x168xf32, #tpu.memory_space<vmem>>, vector<112x168xf32>
    %cst_41 = arith.constant dense<0.000000e+00> : vector<112x128xf32>
    %77 = tpu.matmul %76, %75, %cst_41 {dimension_numbers = #tpu.dot_dimension_numbers<[1], [0], [0], [1], [0, 0, 1, 1], [], []>} : vector<112x168xf32>, vector<168x128xf32>, vector<112x128xf32> -> vector<112x128xf32>
    %78 = vector.shape_cast %77 : vector<112x128xf32> to vector<7x16x128xf32>
    %c0_42 = arith.constant 0 : index
    %c0_43 = arith.constant 0 : index
    %79 = vector.load %arg6[%c0_42, %c0_43] : memref<16x1xf32, #tpu.memory_space<vmem>>, vector<16x1xf32>
    %80 = vector.shape_cast %79 : vector<16x1xf32> to vector<1x16x1xf32>
    %81 = vector.broadcast %80 : vector<1x16x1xf32> to vector<7x16x128xf32>
    %82 = arith.addf %78, %81 : vector<7x16x128xf32>
    %83 = vector.broadcast %2 : vector<1x1x128xf32> to vector<7x16x128xf32>
    %84 = arith.mulf %82, %83 : vector<7x16x128xf32>
    %cst_44 = arith.constant dense<0.000000e+00> : vector<7x16xf32>
    %85 = vector.multi_reduction <add>, %84, %cst_44 [2] : vector<7x16x128xf32> to vector<7x16xf32>
    %86 = vector.shape_cast %85 : vector<7x16xf32> to vector<7x16x1xf32>
    %cst_45 = arith.constant dense<0.000000e+00> : vector<16x1xf32>
    %87 = vector.multi_reduction <add>, %86, %cst_45 [0] : vector<7x16x1xf32> to vector<16x1xf32>
    %88 = vector.shape_cast %87 : vector<16x1xf32> to vector<1x16x1xf32>
    %89 = arith.mulf %84, %84 : vector<7x16x128xf32>
    %cst_46 = arith.constant dense<0.000000e+00> : vector<7x16xf32>
    %90 = vector.multi_reduction <add>, %89, %cst_46 [2] : vector<7x16x128xf32> to vector<7x16xf32>
    %91 = vector.shape_cast %90 : vector<7x16xf32> to vector<7x16x1xf32>
    %cst_47 = arith.constant dense<0.000000e+00> : vector<16x1xf32>
    %92 = vector.multi_reduction <add>, %91, %cst_47 [0] : vector<7x16x1xf32> to vector<16x1xf32>
    %93 = vector.shape_cast %92 : vector<16x1xf32> to vector<1x16x1xf32>
    %cst_48 = arith.constant 0.00446428591 : f32
    %94 = vector.broadcast %cst_48 : f32 to vector<1x16x1xf32>
    %95 = arith.mulf %88, %94 : vector<1x16x1xf32>
    %cst_49 = arith.constant 0.00446428591 : f32
    %96 = vector.broadcast %cst_49 : f32 to vector<1x16x1xf32>
    %97 = arith.mulf %93, %96 : vector<1x16x1xf32>
    %98 = arith.mulf %95, %95 : vector<1x16x1xf32>
    %99 = arith.subf %97, %98 : vector<1x16x1xf32>
    %c0_50 = arith.constant 0 : index
    %c0_51 = arith.constant 0 : index
    %100 = vector.load %arg9[%c0_50, %c0_51] : memref<16x1xf32, #tpu.memory_space<vmem>>, vector<16x1xf32>
    %101 = vector.shape_cast %100 : vector<16x1xf32> to vector<1x16x1xf32>
    %cst_52 = arith.constant 9.99999974E-6 : f32
    %102 = vector.broadcast %cst_52 : f32 to vector<1x16x1xf32>
    %103 = arith.addf %99, %102 : vector<1x16x1xf32>
    %104 = math.rsqrt %103 : vector<1x16x1xf32>
    %105 = arith.mulf %101, %104 : vector<1x16x1xf32>
    %c0_53 = arith.constant 0 : index
    %c0_54 = arith.constant 0 : index
    %106 = vector.load %arg10[%c0_53, %c0_54] : memref<16x1xf32, #tpu.memory_space<vmem>>, vector<16x1xf32>
    %107 = vector.shape_cast %106 : vector<16x1xf32> to vector<1x16x1xf32>
    %108 = arith.mulf %95, %105 : vector<1x16x1xf32>
    %109 = arith.subf %107, %108 : vector<1x16x1xf32>
    %110 = vector.broadcast %105 : vector<1x16x1xf32> to vector<7x16x128xf32>
    %111 = arith.mulf %82, %110 : vector<7x16x128xf32>
    %112 = vector.broadcast %109 : vector<1x16x1xf32> to vector<7x16x128xf32>
    %113 = arith.addf %111, %112 : vector<7x16x128xf32>
    %114 = arith.addf %113, %9 : vector<7x16x128xf32>
    %115 = vector.shape_cast %114 : vector<7x16x128xf32> to vector<112x128xf32>
    %c0_55 = arith.constant 0 : index
    %c0_56 = arith.constant 0 : index
    %116 = vector.load %arg13[%c0_55, %c0_56] : memref<112x128xf32, #tpu.memory_space<vmem>>, vector<112x128xf32>
    tpu.vector_store %arg13[%c0_55, %c0_56], %115 {strides = array<i32>} : memref<112x128xf32, #tpu.memory_space<vmem>>, vector<112x128xf32>,
    return
  }
}

</mosaic_0001>

<bundles_post_ra>
// kernel: dec_basic_block.1
= control target key start
LH: loop header
LB: loop body
LE: loop exit
PB: predicated region body
PF: predicated region fallthrough
CT: control target
= control target key end

     0   :  { %s1976_s14 = smov 1   ;;  %vm85_vm0 = vcmask 130048   ;;  %s1977_s27 = smov 127   ;;  %v1978_v35 = vmov 0.0|0.0   ;;  %vm1979_vm1 = vmmov 0   ;;  %v1980_v37 = vmov 0.0   ;;  %s2781_s0 = inlined_call_operand.vmem [shape: f32[112,128], index: 0, kind: input, shape index: {}]   ;;  %s2782_s1 = inlined_call_operand.vmem [shape: f32[7,16,16], index: 1, kind: input, shape index: {}]   ;;  %s2783_s3 = inlined_call_operand.vmem [shape: f32[56,336], index: 3, kind: input, shape index: {}]   ;;  %s2784_s4 = inlined_call_operand.vmem [shape: f32[8,1], index: 4, kind: input, shape index: {}]   ;;  %s2785_s11 = inlined_call_operand.vmem [shape: f32[3,1,128], index: 11, kind: input, shape index: {}]   ;;  %s2786_s12 = inlined_call_operand.vmem [shape: f32[1,128], index: 12, kind: input, shape index: {}]   ;;  %s2787_s7 = inlined_call_operand.vmem [shape: f32[8,1], index: 7, kind: input, shape index: {}]   ;;  %s2788_s8 = inlined_call_operand.vmem [shape: f32[8,1], index: 8, kind: input, shape index: {}]   ;;  %s2789_s6 = inlined_call_operand.vmem [shape: f32[16,1], index: 6, kind: input, shape index: {}]   ;;  %s2790_s5 = inlined_call_operand.vmem [shape: f32[112,168], index: 5, kind: input, shape index: {}]   ;;  %s2791_s2 = inlined_call_operand.vmem [shape: f32[16,1], index: 2, kind: input, shape index: {}]   ;;  %s2792_s9 = inlined_call_operand.vmem [shape: f32[16,1], index: 9, kind: input, shape index: {}]   ;;  %s2793_s10 = inlined_call_operand.vmem [shape: f32[16,1], index: 10, kind: input, shape index: {}]   ;;  %s2794_s13 = inlined_call_operand.vmem [shape: f32[112,128], index: 13, kind: output, shape index: {}]  }
   0x1   :  { %v2055_v0 = vld [vmem:[%s2781_s0 + $0x10] sm:$0xff]  ;;  %v2060_v1 = vld [vmem:[%s2781_s0] sm:$0xff]  ;;  %v2065_v2 = vld [vmem:[%s2781_s0 + $0x18] sm:$0xff]  ;;  %v1981_v38 = vmov 0   ;;  %vm773_vm2 = vcmask 654336   ;;  %vm1194_vm10 = vcmask 326656  }
   0x2   :  { %657 = vrot.lane.b32.xlu1 %v2055_v0, %s1976_s14  ;;  %653 = vrot.lane.b32.xlu0 %v2060_v1, %s1976_s14  ;;  %v2074_v3 = vld [vmem:[%s2781_s0 + $0x8] sm:$0xff]  ;;  %v1839_v4 = vpack.c.bf16 %v2065_v2, %v2055_v0  ;;  %v2081_v5 = vld [vmem:[%s2781_s0 + $0x38] sm:$0xff] }
   0x3   :  { %v2086_v6 = vld [vmem:[%s2781_s0 + $0x30] sm:$0xff]  ;;  %v2090_v7 = vpack.c.bf16 %v2074_v3, %v2060_v1  ;;  %v49_v9 = vld [vmem:[%s2781_s0 + $0x28] sm:$0xff]  ;;  %v2102_v10 = vld [vmem:[%s2781_s0 + $0x58] sm:$0xff]  ;;  %1968 = vset.pattern.permute.xlu0 %v1981_v38  ;;  %1969 = vset.pattern.permute.xlu1 %v1981_v38 }
   0x4   :  { %1840 = vmatprep.subr.bf16.mxu1 %v1839_v4  ;;  %v2094_v8 = vpack.c.bf16 %v2081_v5, %v2086_v6  ;;  %v2112_v11 = vld [vmem:[%s2781_s0 + $0x50] sm:$0xff]  ;;  %v48_v13 = vld [vmem:[%s2781_s0 + $0x20] sm:$0xff]  ;;  %v62_v14 = vld [vmem:[%s2782_s1 + $0x18] sm:$0xff] }
   0x5   :  { %1842 = vmatpush3.bf16.msra.mxu1 %v1839_v4  ;;  %1836 = vmatprep.subr.bf16.mxu0 %v2090_v7  ;;  %v61_v12 = vld [vmem:[%s2782_s1 + $0x10] sm:$0xff]  ;;  %v2130_v16 = vpack.c.bf16 %v2102_v10, %v2112_v11  ;;  %v59_v17 = vld [vmem:[%s2782_s1] sm:$0xff]  ;;  %v2137_v18 = vpack.c.bf16 %v49_v9, %v48_v13  ;;  %v66_v19 = vld [vmem:[%s2782_s1 + $0x38] sm:$0xff] }
   0x6   :  { %659 = vrot.lane.b32.xlu1 %v2065_v2, %s1976_s14  ;;  %655 = vrot.lane.b32.xlu0 %v2074_v3, %s1976_s14  ;;  %v65_v15 = vld [vmem:[%s2782_s1 + $0x30] sm:$0xff]  ;;  %v53_v21 = vld [vmem:[%s2781_s0 + $0x48] sm:$0xff] }
   0x7   :  { %1756 = vmatprep.mubr.msk.f32.mxu1 %vm85_vm0, %v61_v12  ;;  %1848 = vmatprep.subr.bf16.mxu1 %v2094_v8  ;;  %v69_v20 = vld [vmem:[%s2782_s1 + $0x50] sm:$0xff]  ;;  %v52_v22 = vld [vmem:[%s2781_s0 + $0x40] sm:$0xff]  ;;  %v60_v23 = vld [vmem:[%s2782_s1 + $0x8] sm:$0xff] }
   0x8   :  { %1757 = vmatmul.mubr.msk.f32.vlgmr.msra.gmra.mrb[0].mxu1 %vm85_vm0, %v62_v14  ;;  %1838 = vmatpush3.bf16.msra.mxu0 %v2090_v7  ;;  %v70_v24 = vld [vmem:[%s2782_s1 + $0x58] sm:$0xff]  ;;  %v2167_v25 = vpack.c.bf16 %v53_v21, %v52_v22  ;;  %v63_v26 = vld [vmem:[%s2782_s1 + $0x20] sm:$0xff]  ;;  %v57_v27 = vld [vmem:[%s2781_s0 + $0x68] sm:$0xff] }
   0x9   :  { %1850 = vmatpush3.bf16.msra.mxu1 %v2094_v8  ;;  %1770 = vmatprep.mubr.msk.f32.mxu1 %vm85_vm0, %v65_v15  ;;  %v56_v28 = vld [vmem:[%s2781_s0 + $0x60] sm:$0xff]  ;;  %v64_v29 = vld [vmem:[%s2782_s1 + $0x28] sm:$0xff] }
   0xa   :  { %663 = vrot.lane.b32.xlu1 %v49_v9, %s1976_s14  ;;  %661 = vrot.lane.b32.xlu0 %v48_v13, %s1976_s14  ;;  %v67_v30 = vld [vmem:[%s2782_s1 + $0x40] sm:$0xff]  ;;  %v2193_v31 = vpack.c.bf16 %v57_v27, %v56_v28  ;;  %v68_v32 = vld [vmem:[%s2782_s1 + $0x48] sm:$0xff] }
   0xb   :  { %1856 = vmatprep.subr.bf16.mxu1 %v2130_v16  ;;  %1749 = vmatprep.mubr.msk.f32.mxu0 %vm85_vm0, %v59_v17  ;;  %v71_v33 = vld [vmem:[%s2782_s1 + $0x60] sm:$0xff]  ;;  %v72_v34 = vld [vmem:[%s2782_s1 + $0x68] sm:$0xff] }
   0xc   :  { %1771 = vmatmul.mubr.msk.f32.vlgmr.msra.gmra.mrb[2].mxu1 %vm85_vm0, %v66_v19  ;;  %1844 = vmatprep.subr.bf16.mxu0 %v2137_v18  ;;  %v753_v36 = vld [vmem:[%s2783_s3 + $0x8] sm:$0xff]  ;;  %v995_v39 = vld [vmem:[%s2784_s4] sm:$0xff] }
   0xd   :  { %1858 = vmatpush3.bf16.msra.mxu1 %v2130_v16  ;;  %1784 = vmatprep.mubr.msk.f32.mxu1 %vm85_vm0, %v69_v20  ;;  %v2254_v42 = vld [vmem:[%s2785_s11] ss:$0 sm:$0xff]  ;;  %v2266_v57 = vld [vmem:[%s2785_s11 + $0x2] ss:$0 sm:$0xff] }
   0xe   :  { %667 = vrot.lane.b32.xlu1 %v2081_v5, %s1976_s14  ;;  %665 = vrot.lane.b32.xlu0 %v2086_v6, %s1976_s14 }
   0xf   :  { %1864 = vmatprep.subr.bf16.mxu1 %v1839_v4  ;;  %1750 = vmatmul.mubr.msk.f32.vlgmr.msra.gmra.mrb[0].mxu0 %vm85_vm0, %v60_v23 }
  0x10   :  { %1846 = vmatpush3.bf16.msra.mxu0 %v2137_v18  ;;  %1785 = vmatmul.mubr.msk.f32.vlgmr.msra.gmra.mrb[4].mxu1 %vm85_vm0, %v70_v24 }
  0x11   :  { %1763 = vmatprep.mubr.msk.f32.mxu0 %vm85_vm0, %v63_v26  ;;  %1852 = vmatprep.subr.bf16.mxu0 %v2167_v25 }
  0x12   :  { %712 = vrot.lane.b32.xlu1 %v49_v9, %s1977_s27  ;;  %710 = vrot.lane.b32.xlu0 %v48_v13, %s1977_s27 }
  0x13   :  { %1764 = vmatmul.mubr.msk.f32.vlgmr.msra.gmra.mrb[2].mxu0 %vm85_vm0, %v64_v29  ;;  %859 = vmatprep.mubr.f32.mxu1 %v753_v36 }
  0x14   :  { %1854 = vmatpush3.bf16.msra.mxu0 %v2167_v25  ;;  %1777 = vmatprep.mubr.msk.f32.mxu0 %vm85_vm0, %v67_v30 }
  0x15   :  { %1860 = vmatprep.subr.bf16.mxu0 %v2193_v31 }
  0x16   :  { %671 = vrot.lane.b32.xlu1 %v53_v21, %s1976_s14  ;;  %669 = vrot.lane.b32.xlu0 %v52_v22, %s1976_s14 }
  0x17   :  { %1778 = vmatmul.mubr.msk.f32.vlgmr.msra.gmra.mrb[4].mxu0 %vm85_vm0, %v68_v32 }
  0x18   :  { %1862 = vmatpush3.bf16.msra.mxu0 %v2193_v31  ;;  %1791 = vmatprep.mubr.msk.f32.mxu0 %vm85_vm0, %v71_v33 }
  0x19   :  { %1895 = vmatprep.subr.bf16.mxu0 %v1978_v35 }
  0x1a   :  { %716 = vrot.lane.b32.xlu1 %v2081_v5, %s1977_s27  ;;  %714 = vrot.lane.b32.xlu0 %v2086_v6, %s1977_s27 }
  0x1b   :  { %1792 = vmatmul.mubr.msk.f32.vlgmr.msra.gmra.mrb[6].mxu0 %vm85_vm0, %v72_v34 }
  0x1c   :  { %1814 = vmatprep.mubr.msk.f32.mxu0 %vm1979_vm1, %v1980_v37 }
  0x1e   :  { %675 = vrot.lane.b32.xlu1 %v2102_v10, %s1976_s14  ;;  %673 = vrot.lane.b32.xlu0 %v2112_v11, %s1976_s14 }
  0x22   :  { %704 = vrot.lane.b32.xlu1 %v2074_v3, %s1977_s27  ;;  %702 = vrot.lane.b32.xlu0 %v2060_v1, %s1977_s27 }
  0x26   :  { %720 = vrot.lane.b32.xlu1 %v53_v21, %s1977_s27  ;;  %718 = vrot.lane.b32.xlu0 %v52_v22, %s1977_s27 }
  0x2a   :  { %679 = vrot.lane.b32.xlu1 %v57_v27, %s1976_s14  ;;  %677 = vrot.lane.b32.xlu0 %v56_v28, %s1976_s14 }
  0x2e   :  { %708 = vrot.lane.b32.xlu1 %v2065_v2, %s1977_s27  ;;  %706 = vrot.lane.b32.xlu0 %v2055_v0, %s1977_s27 }
  0x32   :  { %724 = vrot.lane.b32.xlu1 %v2102_v10, %s1977_s27  ;;  %722 = vrot.lane.b32.xlu0 %v2112_v11, %s1977_s27 }
  0x36   :  { %728 = vrot.lane.b32.xlu1 %v57_v27, %s1977_s27  ;;  %726 = vrot.lane.b32.xlu0 %v56_v28, %s1977_s27 }
  0x3a   :  { %998 = vperm.xlu0 %1968, %v995_v39  }
  0x74   :  { %v658_v40 = vpop.permute.xlu1 %657  ;;  %v654_v41 = vpop.permute.xlu0 %653 }
  0x75   :  { %v688_v45 = vmul.f32 %v2254_v42, %v654_v41  ;;  %v690_v51 = vmul.f32 %v2254_v42, %v658_v40 }
  0x78   :  { %v660_v43 = vpop.permute.xlu1 %659  ;;  %v656_v44 = vpop.permute.xlu0 %655 }
  0x79   :  { %v689_v46 = vmul.f32 %v2254_v42, %v656_v44  ;;  %v691_v47 = vmul.f32 %v2254_v42, %v660_v43 }
  0x7b   :  { %v1865_v48 = vpack.c.bf16 %v689_v46, %v688_v45  ;;  %v1869_v52 = vpack.c.bf16 %v691_v47, %v690_v51  ;;  %v752_v46 = vld [vmem:[%s2783_s3] sm:$0xff] }
  0x7c   :  { %v664_v49 = vpop.permute.xlu1 %663  ;;  %v662_v50 = vpop.permute.xlu0 %661 }
  0x7d   :  { %1866 = vmatpush3.bf16.msra.mxu1 %v1865_v48  ;;  %v693_v53 = vmul.f32 %v2254_v42, %v664_v49  ;;  %v692_v54 = vmul.f32 %v2254_v42, %v662_v50  ;;  %v756_v48 = vld [vmem:[%s2783_s3 + $0x20] sm:$0xff] }
  0x7e   :  { %1868 = vmatprep.subr.bf16.mxu1 %v2137_v18 }
  0x7f   :  { %v1873_v58 = vpack.c.bf16 %v693_v53, %v692_v54  ;;  %v759_v54 = vld [vmem:[%s2783_s3 + $0x38] sm:$0xff] }
  0x80   :  { %v668_v55 = vpop.permute.xlu1 %667  ;;  %v666_v56 = vpop.permute.xlu0 %665 }
  0x81   :  { %1870 = vmatpush3.bf16.msra.mxu1 %v1869_v52  ;;  %v695_v59 = vmul.f32 %v2254_v42, %v668_v55  ;;  %v694_v60 = vmul.f32 %v2254_v42, %v666_v56  ;;  %v754_v55 = vld [vmem:[%s2783_s3 + $0x10] sm:$0xff] }
  0x82   :  { %1872 = vmatprep.subr.bf16.mxu1 %v2094_v8  ;;  %v758_v56 = vld [vmem:[%s2783_s3 + $0x30] sm:$0xff] }
  0x83   :  { %v1877_v1 = vpack.c.bf16 %v695_v59, %v694_v60  ;;  %v757_v59 = vld [vmem:[%s2783_s3 + $0x28] sm:$0xff] }
  0x84   :  { %v713_v61 = vpop.permute.xlu1 %712  ;;  %v711_v62 = vpop.permute.xlu0 %710  ;;  %v761_v60 = vld [vmem:[%s2783_s3 + $0x48] sm:$0xff] }
  0x85   :  { %v743_v63 = vmul.f32 %v2266_v57, %v713_v61  ;;  %v742_v0 = vmul.f32 %v2266_v57, %v711_v62  ;;  %1874 = vmatpush3.bf16.msra.mxu1 %v1873_v58  ;;  %v762_v58 = vld [vmem:[%s2783_s3 + $0x50] sm:$0xff]  ;;  %v765_v61 = vld [vmem:[%s2783_s3 + $0x68] sm:$0xff]  ;;  %v760_v62 = vld [vmem:[%s2783_s3 + $0x40] sm:$0xff] }
  0x86   :  { %1876 = vmatprep.subr.bf16.mxu1 %v2167_v25 }
  0x87   :  { %v1896_v2 = vpack.c.bf16 %v743_v63, %v742_v0  ;;  %v764_v63 = vld [vmem:[%s2783_s3 + $0x60] sm:$0xff] }
  0x88   :  { %v672_v3 = vpop.permute.xlu1 %671  ;;  %v670_v4 = vpop.permute.xlu0 %669  ;;  %v768_v0 = vld [vmem:[%s2783_s3 + $0x80] sm:$0xff] }
  0x89   :  { %v697_v5 = vmul.f32 %v2254_v42, %v672_v3  ;;  %v696_v6 = vmul.f32 %v2254_v42, %v670_v4  ;;  %1878 = vmatpush3.bf16.msra.mxu1 %v1877_v1  ;;  %1897 = vmatpush3.bf16.msra.mxu0 %v1896_v2  ;;  %v763_v1 = vld [vmem:[%s2783_s3 + $0x58] sm:$0xff]  ;;  %v766_v4 = vld [vmem:[%s2783_s3 + $0x70] sm:$0xff] }
  0x8a   :  { %1880 = vmatprep.subr.bf16.mxu1 %v2130_v16  ;;  %1898 = vmatprep.subr.bf16.mxu0 %v1978_v35  ;;  %v767_v2 = vld [vmem:[%s2783_s3 + $0x78] sm:$0xff] }
  0x8b   :  { %v1881_v8 = vpack.c.bf16 %v697_v5, %v696_v6  ;;  %v771_v3 = vld [vmem:[%s2783_s3 + $0x98] sm:$0xff]  ;;  %v770_v5 = vld [vmem:[%s2783_s3 + $0x90] sm:$0xff]  ;;  %v769_v6 = vld [vmem:[%s2783_s3 + $0x88] sm:$0xff] }
  0x8c   :  { %v717_v9 = vpop.permute.xlu1 %716  ;;  %v715_v10 = vpop.permute.xlu0 %714 }
  0x8d   :  { %v745_v11 = vmul.f32 %v2266_v57, %v717_v9  ;;  %v744_v12 = vmul.f32 %v2266_v57, %v715_v10  ;;  %1882 = vmatpush3.bf16.msra.mxu1 %v1881_v8  ;;  %v772_v8 = vld [vmem:[%s2783_s3 + $0xa0] sm:$0xff] }
  0x8e   :  { %1884 = vmatprep.subr.bf16.mxu1 %v2193_v31 }
  0x8f   :  { %v1899_v13 = vpack.c.bf16 %v745_v11, %v744_v12 }
  0x90   :  { %v676_v14 = vpop.permute.xlu1 %675  ;;  %v674_v15 = vpop.permute.xlu0 %673 }
  0x91   :  { %v699_v17 = vmul.f32 %v2254_v42, %v676_v14  ;;  %v698_v18 = vmul.f32 %v2254_v42, %v674_v15  ;;  %1900 = vmatpush3.bf16.msra.mxu0 %v1899_v13 }
  0x92   :  { %1901 = vmatprep.subr.bf16.mxu0 %v1978_v35 }
  0x93   :  { %v1885_v16 = vpack.c.bf16 %v699_v17, %v698_v18 }
  0x94   :  { %v705_v19 = vpop.permute.xlu1 %704  ;;  %v703_v20 = vpop.permute.xlu0 %702 }
  0x95   :  { %v739_v21 = vmul.f32 %v2266_v57, %v705_v19  ;;  %v738_v22 = vmul.f32 %v2266_v57, %v703_v20  ;;  %1886 = vmatpush3.bf16.msra.mxu1 %v1885_v16 }
  0x97   :  { %v1887_v23 = vpack.c.bf16 %v739_v21, %v738_v22 }
  0x98   :  { %v721_v24 = vpop.permute.xlu1 %720  ;;  %v719_v25 = vpop.permute.xlu0 %718 }
  0x99   :  { %v747_v26 = vmul.f32 %v2266_v57, %v721_v24  ;;  %v746_v27 = vmul.f32 %v2266_v57, %v719_v25  ;;  %1888 = vmatprep.subr.bf16.mxu1 %v1887_v23 }
  0x9b   :  { %v1902_v28 = vpack.c.bf16 %v747_v26, %v746_v27 }
  0x9c   :  { %v680_v29 = vpop.permute.xlu1 %679  ;;  %v678_v30 = vpop.permute.xlu0 %677 }
  0x9d   :  { %v701_v31 = vmul.f32 %v2254_v42, %v680_v29  ;;  %v700_v32 = vmul.f32 %v2254_v42, %v678_v30  ;;  %1903 = vmatpush3.bf16.msra.mxu0 %v1902_v28 }
  0x9e   :  { %1904 = vmatprep.subr.bf16.mxu0 %v1978_v35 }
  0x9f   :  { %v1889_v33 = vpack.c.bf16 %v701_v31, %v700_v32 }
  0xa0   :  { %v709_v34 = vpop.permute.xlu1 %708  ;;  %v707_v36 = vpop.permute.xlu0 %706 }
  0xa1   :  { %v741_v38 = vmul.f32 %v2266_v57, %v709_v34  ;;  %v740_v39 = vmul.f32 %v2266_v57, %v707_v36  ;;  %1890 = vmatpush3.bf16.msra.mxu1 %v1889_v33  ;;  %v2411_v36 = vld [vmem:[%s2786_s12] ss:$0 sm:$0xff] }
  0xa3   :  { %v1891_v40 = vpack.c.bf16 %v741_v38, %v740_v39 }
  0xa4   :  { %v725_v41 = vpop.permute.xlu1 %724  ;;  %v723_v43 = vpop.permute.xlu0 %722 }
  0xa5   :  { %v749_v44 = vmul.f32 %v2266_v57, %v725_v41  ;;  %v748_v45 = vmul.f32 %v2266_v57, %v723_v43  ;;  %1892 = vmatprep.subr.bf16.mxu1 %v1891_v40 }
  0xa6   :  { %1894 = vmatpush3.bf16.msra.mxu1 %v2090_v7  ;;  %v755_v7 = vld [vmem:[%s2783_s3 + $0x18] sm:$0xff] }
  0xa7   :  { %v1905_v47 = vpack.c.bf16 %v749_v44, %v748_v45  ;;  %1940 = vmatprep.subr.bf16.mxu1 %v1978_v35 }
  0xa8   :  { %v729_v49 = vpop.permute.xlu1 %728  ;;  %v727_v50 = vpop.permute.xlu0 %726 }
  0xa9   :  { %v751_v51 = vmul.f32 %v2266_v57, %v729_v49  ;;  %v750_v52 = vmul.f32 %v2266_v57, %v727_v50  ;;  %1906 = vmatpush3.bf16.msra.mxu0 %v1905_v47  ;;  %860 = vmatmul.mubr.f32.vlgmr.msra.gmra.mrb[6].mxu1 %v752_v46 }
  0xaa   :  { %1907 = vmatprep.subr.bf16.mxu0 %v1978_v35  ;;  %864 = vmatprep.mubr.f32.mxu1 %v756_v48 }
  0xab   :  { %v1908_v53 = vpack.c.bf16 %v751_v51, %v750_v52 }
  0xad   :  { %1909 = vmatpush3.bf16.msra.mxu0 %v1908_v53  ;;  %865 = vmatmul.mubr.f32.gmra.mrb[8].mxu1 %v755_v7 }
  0xae   :  { %869 = vmatprep.mubr.f32.mxu1 %v759_v54  ;;  %1910 = vmatprep.subr.bf16.mxu0 %v1978_v35 }
  0xb0   :  { %1815 = vmatmul.mubr.msk.f32.vlgmr.msra.gmra.mrb[8].mxu0 %vm773_vm2, %v754_v55 }
  0xb1   :  { %1817 = vmatprep.mubr.msk.f32.mxu0 %vm1979_vm1, %v1980_v37  ;;  %870 = vmatmul.mubr.f32.gmra.mrb[10].mxu1 %v758_v56 }
  0xb2   :  { %874 = vmatprep.mubr.f32.mxu1 %v762_v58 }
  0xb4   :  { %1818 = vmatmul.mubr.msk.f32.gmra.mrb[10].mxu0 %vm773_vm2, %v757_v59 }
  0xb5   :  { %1820 = vmatprep.mubr.msk.f32.mxu0 %vm1979_vm1, %v1980_v37  ;;  %875 = vmatmul.mubr.f32.gmra.mrb[12].mxu1 %v761_v60 }
  0xb6   :  { %879 = vmatprep.mubr.f32.mxu1 %v765_v61 }
  0xb8   :  { %1821 = vmatmul.mubr.msk.f32.gmra.mrb[12].mxu0 %vm773_vm2, %v760_v62 }
  0xb9   :  { %1823 = vmatprep.mubr.msk.f32.mxu0 %vm1979_vm1, %v1980_v37  ;;  %880 = vmatmul.mubr.f32.gmra.mrb[14].mxu1 %v764_v63  ;;  %v999_v30 = vpop.permute.xlu0 %998 }
  0xba   :  { %884 = vmatprep.mubr.f32.mxu1 %v768_v0 }
  0xbc   :  { %1824 = vmatmul.mubr.msk.f32.gmra.mrb[14].mxu0 %vm773_vm2, %v763_v1 }
  0xbd   :  { %1826 = vmatprep.mubr.msk.f32.mxu0 %vm1979_vm1, %v1980_v37  ;;  %885 = vmatmul.mubr.f32.gmra.mrb[16].mxu1 %v767_v2 }
  0xbe   :  { %889 = vmatprep.mubr.f32.mxu1 %v771_v3 }
  0xc0   :  { %1827 = vmatmul.mubr.msk.f32.gmra.mrb[16].mxu0 %vm773_vm2, %v766_v4 }
  0xc1   :  { %1829 = vmatprep.mubr.msk.f32.mxu0 %vm1979_vm1, %v1980_v37  ;;  %890 = vmatmul.mubr.f32.gmra.mrb[18].mxu1 %v770_v5 }
  0xc4   :  { %1830 = vmatmul.mubr.msk.f32.gmra.mrb[18].mxu0 %vm773_vm2, %v769_v6 }
  0xc5   :  { %1832 = vmatprep.mubr.msk.f32.mxu0 %vm1979_vm1, %v1980_v37 }
  0xc8   :  { %1833 = vmatmul.mubr.msk.f32.gmra.mrb[20].mxu0 %vm773_vm2, %v772_v8 }
  0xdb   :  { %v2380_v9 = vpop.f32.mrb[0].mxu1 }
  0xdc   :  { %v2382_v10 = vpop.f32.mrb[1].mxu1 }
  0xdf   :  { %v2384_v11 = vpop.f32.mrb[2].mxu1 }
  0xe0   :  { %v2386_v12 = vpop.f32.mrb[3].mxu1 }
  0xe2   :  { %v2388_v13 = vpop.f32.mrb[0].mxu0 }
  0xe3   :  { %v2390_v14 = vpop.f32.mrb[4].mxu1  ;;  %v2392_v15 = vpop.f32.mrb[1].mxu0 }
  0xe4   :  { %v2394_v17 = vpop.f32.mrb[5].mxu1 }
  0xe6   :  { %v2396_v18 = vpop.f32.mrb[2].mxu0 }
  0xe7   :  { %v2398_v16 = vpop.f32.mrb[3].mxu0 }
  0xea   :  { %v2400_v19 = vpop.f32.mrb[4].mxu0 }
  0xeb   :  { %v2402_v20 = vpop.f32.mrb[5].mxu0 }
  0xee   :  { %v2404_v21 = vpop.f32.mrb[6].mxu0 }
  0xef   :  { %2796 = vst [vmem:[#allocation2_spill] sm:$0xff] %v2404_v21  ;;  %v2406_v22 = vpop.f32.mrb[7].mxu0 }
 0x17c   :  { %v1707_v23 = vpop.f32.mrb[6].mxu1 }
 0x17d   :  { %v1708_v24 = vpop.f32.mrb[7].mxu1 }
 0x17e   :  { %v1709_v25 = vadd.f32 %v1708_v24, %v1707_v23 }
 0x180   :  { %v1710_v26 = vpop.f32.mrb[8].mxu1 }
 0x181   :  { %v1711_v27 = vpop.f32.mrb[9].mxu1 }
 0x182   :  { %v1712_v28 = vadd.f32 %v1711_v27, %v1710_v26 }
 0x183   :  { %v961_v29 = vpop.f32.mrb[8].mxu0 }
 0x184   :  { %v962_v31 = vadd.f32 %v1709_v25, %v961_v29  ;;  %v1816_v32 = vpop.f32.mrb[9].mxu0  ;;  %v1713_v33 = vpop.f32.mrb[10].mxu1 }
 0x185   :  { %v1714_v34 = vpop.f32.mrb[11].mxu1 }
 0x186   :  { %v1715_v38 = vadd.f32 %v1714_v34, %v1713_v33  ;;  %v2413_v39 = vadd.f32 %v999_v30, %v962_v31 }
 0x187   :  { %v966_v40 = vpop.f32.mrb[10].mxu0 }
 0x188   :  { %v967_v41 = vadd.f32 %v1712_v28, %v966_v40  ;;  %v1819_v43 = vpop.f32.mrb[11].mxu0  ;;  %v1014_v44 = vmul.f32 %v2411_v36, %v2413_v39  ;;  %v1716_v45 = vpop.f32.mrb[12].mxu1 }
 0x189   :  { %v1717_v46 = vpop.f32.mrb[13].mxu1 }
 0x18a   :  { %v2417_v47 = vadd.f32 %v999_v30, %v967_v41  ;;  %1021 = vadd.xlane.f32.xlu1 %v1014_v44  ;;  %v1718_v48 = vadd.f32 %v1717_v46, %v1716_v45  ;;  %v1041_v49 = vmul.f32 %v1014_v44, %v1014_v44 }
 0x18b   :  { %v971_v50 = vpop.f32.mrb[12].mxu0 }
 0x18c   :  { %v972_v51 = vadd.f32 %v1715_v38, %v971_v50  ;;  %1048 = vadd.xlane.f32.xlu0 %v1041_v49  ;;  %v1822_v52 = vpop.f32.mrb[13].mxu0  ;;  %v1719_v7 = vpop.f32.mrb[14].mxu1  ;;  %v1015_v53 = vmul.f32 %v2411_v36, %v2417_v47 }
 0x18d   :  { %v1720_v54 = vpop.f32.mrb[15].mxu1 }
 0x18e   :  { %v2421_v55 = vadd.f32 %v999_v30, %v972_v51  ;;  %v1721_v56 = vadd.f32 %v1720_v54, %v1719_v7  ;;  %v1042_v58 = vmul.f32 %v1015_v53, %v1015_v53 }
 0x18f   :  { %v976_v59 = vpop.f32.mrb[14].mxu0 }
 0x190   :  { %v977_v60 = vadd.f32 %v1718_v48, %v976_v59  ;;  %1023 = vadd.xlane.f32.xlu0 %v1015_v53  ;;  %1050 = vadd.xlane.f32.xlu1 %v1042_v58  ;;  %v1825_v61 = vpop.f32.mrb[15].mxu0  ;;  %v1722_v62 = vpop.f32.mrb[16].mxu1  ;;  %v1016_v2 = vmul.f32 %v2411_v36, %v2421_v55 }
 0x191   :  { %v1723_v63 = vpop.f32.mrb[17].mxu1 }
 0x192   :  { %v2423_v0 = vadd.f32 %v999_v30, %v977_v60  ;;  %v1724_v1 = vadd.f32 %v1723_v63, %v1722_v62  ;;  %v1043_v26 = vmul.f32 %v1016_v2, %v1016_v2 }
 0x193   :  { %v981_v3 = vpop.f32.mrb[16].mxu0 }
 0x194   :  { %v982_v4 = vadd.f32 %v1721_v56, %v981_v3  ;;  %1025 = vadd.xlane.f32.xlu1 %v1016_v2  ;;  %v1828_v5 = vpop.f32.mrb[17].mxu0  ;;  %v1017_v6 = vmul.f32 %v2411_v36, %v2423_v0  ;;  %v1725_v8 = vpop.f32.mrb[18].mxu1 }
 0x195   :  { %v1726_v23 = vpop.f32.mrb[19].mxu1 }
 0x196   :  { %v2429_v24 = vadd.f32 %v999_v30, %v982_v4  ;;  %1027 = vadd.xlane.f32.xlu0 %v1017_v6  ;;  %v1727_v25 = vadd.f32 %v1726_v23, %v1725_v8  ;;  %v1044_v33 = vmul.f32 %v1017_v6, %v1017_v6 }
 0x197   :  { %v986_v27 = vpop.f32.mrb[18].mxu0 }
 0x198   :  { %v987_v28 = vadd.f32 %v1724_v1, %v986_v27  ;;  %1052 = vadd.xlane.f32.xlu1 %v1043_v26  ;;  %v1831_v29 = vpop.f32.mrb[19].mxu0  ;;  %v1018_v31 = vmul.f32 %v2411_v36, %v2429_v24 }
 0x19a   :  { %v2433_v32 = vadd.f32 %v999_v30, %v987_v28  ;;  %1029 = vadd.xlane.f32.xlu0 %v1018_v31  ;;  %v1045_v44 = vmul.f32 %v1018_v31, %v1018_v31 }
 0x19b   :  { %v991_v34 = vpop.f32.mrb[20].mxu0 }
 0x19c   :  { %v992_v38 = vadd.f32 %v1727_v25, %v991_v34  ;;  %1054 = vadd.xlane.f32.xlu1 %v1044_v33  ;;  %v1834_v40 = vpop.f32.mrb[21].mxu0  ;;  %v1019_v41 = vmul.f32 %v2411_v36, %v2433_v32 }
 0x19e   :  { %v1007_v43 = vadd.f32 %v999_v30, %v992_v38  ;;  %1031 = vadd.xlane.f32.xlu0 %v1019_v41  ;;  %v1046_v46 = vmul.f32 %v1019_v41, %v1019_v41  ;;  %v1072_v38 = vld [vmem:[%s2787_s7] sm:$0xff] }
 0x1a0   :  { %1056 = vadd.xlane.f32.xlu1 %v1045_v44  ;;  %v1020_v45 = vmul.f32 %v2411_v36, %v1007_v43  ;;  %v1076_v44 = vld [vmem:[%s2788_s8] sm:$0xff] }
 0x1a2   :  { %1033 = vadd.xlane.f32.xlu0 %v1020_v45  ;;  %v1047_v48 = vmul.f32 %v1020_v45, %v1020_v45 }
 0x1a4   :  { %1058 = vadd.xlane.f32.xlu1 %v1046_v46 }
 0x1a6   :  { %1060 = vadd.xlane.f32.xlu0 %v1047_v48 }
 0x217   :  { %v1022_v49 = vpop.xlane.xlu1 %1021 }
 0x219   :  { %v1049_v50 = vpop.xlane.xlu0 %1048 }
 0x21d   :  { %v1051_v51 = vpop.xlane.xlu1 %1050  ;;  %v1024_v52 = vpop.xlane.xlu0 %1023 }
 0x21e   :  { %v1035_v54 = vadd.f32 %v1024_v52, %v1022_v49  ;;  %v1062_v60 = vadd.f32 %v1051_v51, %v1049_v50 }
 0x221   :  { %v1026_v7 = vpop.xlane.xlu1 %1025 }
 0x222   :  { %v1036_v58 = vadd.f32 %v1035_v54, %v1026_v7 }
 0x223   :  { %v1028_v53 = vpop.xlane.xlu0 %1027 }
 0x224   :  { %v1037_v61 = vadd.f32 %v1036_v58, %v1028_v53 }
 0x225   :  { %v1053_v56 = vpop.xlane.xlu1 %1052 }
 0x226   :  { %v1063_v63 = vadd.f32 %v1062_v60, %v1053_v56 }
 0x227   :  { %v1030_v30 = vpop.xlane.xlu0 %1029 }
 0x228   :  { %v1038_v1 = vadd.f32 %v1037_v61, %v1030_v30 }
 0x229   :  { %v1055_v59 = vpop.xlane.xlu1 %1054 }
 0x22a   :  { %v1064_v3 = vadd.f32 %v1063_v63, %v1055_v59 }
 0x22b   :  { %v1032_v62 = vpop.xlane.xlu0 %1031 }
 0x22c   :  { %v1039_v4 = vadd.f32 %v1038_v1, %v1032_v62 }
 0x22d   :  { %v1057_v2 = vpop.xlane.xlu1 %1056 }
 0x22e   :  { %v1065_v6 = vadd.f32 %v1064_v3, %v1057_v2 }
 0x22f   :  { %v1034_v5 = vpop.xlane.xlu0 %1033 }
 0x230   :  { %v1040_v8 = vadd.f32 %v1039_v4, %v1034_v5 }
 0x231   :  { %v1059_v23 = vpop.xlane.xlu1 %1058 }
 0x232   :  { %v1068_v25 = vmul.f32 0.004464286, %v1040_v8  ;;  %v1066_v26 = vadd.f32 %v1065_v6, %v1059_v23 }
 0x233   :  { %v1061_v27 = vpop.xlane.xlu0 %1060 }
 0x234   :  { %v1067_v28 = vadd.f32 %v1066_v26, %v1061_v27  ;;  %v1070_v29 = vmul.f32 %v1068_v25, %v1068_v25  ;;  %v1372_v27 = vld [vmem:[%s2789_s6] sm:$0xff] }
 0x236   :  { %v1069_v31 = vmul.f32 0.004464286, %v1067_v28  ;;  %v1373_v28 = vld [vmem:[%s2789_s6 + $0x8] sm:$0xff] }
 0x238   :  { %v1071_v33 = vsub.f32 %v1069_v31, %v1070_v29  ;;  %v1167_v29 = vld [vmem:[%s2790_s5 + $0x8] sm:$0xff] }
 0x239   :  { %v1183_v31 = vld [vmem:[%s2790_s5 + $0x88] sm:$0xff]  ;;  %1633 = vmatprep.mubr.msk.f32.mxu0 %vm1194_vm10, %v1167_v29  ;;  %v1172_v29 = vld [vmem:[%s2790_s5 + $0x30] sm:$0xff] }
 0x23a   :  { %v1073_v34 = vadd.f32 1e-05, %v1071_v33  ;;  %1641 = vmatprep.mubr.msk.f32.mxu1 %vm1194_vm10, %v1183_v31  ;;  %v1188_v31 = vld [vmem:[%s2790_s5 + $0xb0] sm:$0xff] }
 0x23c   :  { %1970 = vrsqrt.f32 %v1073_v34 }
 0x246   :  { %v1971_v40 = vpop.eup %1970 }
 0x247   :  { %v1075_v41 = vmul.f32 %v1971_v40, %v1072_v38 }
 0x249   :  { %1081 = vperm.xlu1 %1969, %v1075_v41   ;;  %v1077_v45 = vmul.f32 %v1075_v41, %v1068_v25 }
 0x24b   :  { %v1078_v46 = vsub.f32 %v1076_v44, %v1077_v45 }
 0x24d   :  { %1093 = vperm.xlu0 %1968, %v1078_v46  }
 0x2c8   :  { %v1082_v48 = vpop.permute.xlu1 %1081 }
 0x2c9   :  { %v1086_v49 = vmul.f32 %v1082_v48, %v2421_v55  ;;  %v1084_v50 = vmul.f32 %v1082_v48, %v2413_v39  ;;  %v1088_v51 = vmul.f32 %v1082_v48, %v2429_v24  ;;  %v1085_v52 = vmul.f32 %v1082_v48, %v2417_v47 }
 0x2ca   :  { %v1090_v53 = vmul.f32 %v1082_v48, %v1007_v43  ;;  %v1087_v54 = vmul.f32 %v1082_v48, %v2423_v0  ;;  %v1089_v56 = vmul.f32 %v1082_v48, %v2433_v32 }
 0x2cc   :  { %v1094_v7 = vpop.permute.xlu0 %1093 }
 0x2cd   :  { %v1098_v58 = vadd.f32 %v1094_v7, %v1086_v49  ;;  %v1096_v30 = vadd.f32 %v1094_v7, %v1084_v50  ;;  %v1100_v59 = vadd.f32 %v1094_v7, %v1088_v51  ;;  %v1097_v60 = vadd.f32 %v1094_v7, %v1085_v52 }
 0x2ce   :  { %v1102_v61 = vadd.f32 %v1094_v7, %v1090_v53  ;;  %v1099_v62 = vadd.f32 %v1094_v7, %v1087_v54  ;;  %v1101_v63 = vadd.f32 %v1094_v7, %v1089_v56 }
 0x2cf   :  { %vm1105_vm3 = vcmp.ge.f32.partialorder %v1098_v58, 0.0  ;;  %v1112_v55 = vmul.f32 0.01, %v1098_v58  ;;  %vm1103_vm4 = vcmp.ge.f32.partialorder %v1096_v30, 0.0  ;;  %v1110_v39 = vmul.f32 0.01, %v1096_v30 }
 0x2d0   :  { %vm1107_vm5 = vcmp.ge.f32.partialorder %v1100_v59, 0.0  ;;  %v1114_v24 = vmul.f32 0.01, %v1100_v59  ;;  %vm1104_vm6 = vcmp.ge.f32.partialorder %v1097_v60, 0.0  ;;  %v1111_v47 = vmul.f32 0.01, %v1097_v60 }
 0x2d1   :  { %v1119_v43 = vsel %vm1105_vm3, %v1098_v58, %v1112_v55  ;;  %v2450_v1 = vsel %vm1103_vm4, %v1096_v30, %v1110_v39  ;;  %vm1109_vm7 = vcmp.ge.f32.partialorder %v1102_v61, 0.0  ;;  %v1116_v0 = vmul.f32 0.01, %v1102_v61 }
 0x2d2   :  { %1128 = vrot.lane.b32.xlu0 %v1119_v43, %s1976_s14  ;;  %1124 = vrot.lane.b32.xlu1 %v2450_v1, %s1976_s14  ;;  %v1121_v32 = vsel %vm1107_vm5, %v1100_v59, %v1114_v24  ;;  %v1118_v2 = vsel %vm1104_vm6, %v1097_v60, %v1111_v47  ;;  %vm1106_vm8 = vcmp.ge.f32.partialorder %v1099_v62, 0.0  ;;  %v1113_v3 = vmul.f32 0.01, %v1099_v62 }
 0x2d3   :  { %v2455_v4 = vpack.c.bf16 %v1119_v43, %v1118_v2  ;;  %v1123_v5 = vsel %vm1109_vm7, %v1102_v61, %v1116_v0  ;;  %vm1108_vm9 = vcmp.ge.f32.partialorder %v1101_v63, 0.0  ;;  %v1115_v6 = vmul.f32 0.01, %v1101_v63 }
 0x2d4   :  { %v1120_v8 = vsel %vm1106_vm8, %v1099_v62, %v1113_v3 }
 0x2d5   :  { %v2457_v23 = vpack.c.bf16 %v1121_v32, %v1120_v8  ;;  %v1122_v25 = vsel %vm1108_vm9, %v1101_v63, %v1115_v6  ;;  %v1185_v6 = vld [vmem:[%s2790_s5 + $0x98] sm:$0xff] }
 0x2d6   :  { %1132 = vrot.lane.b32.xlu0 %v1121_v32, %s1976_s14  ;;  %1126 = vrot.lane.b32.xlu1 %v1118_v2, %s1976_s14  ;;  %v2461_v26 = vpack.c.bf16 %v1123_v5, %v1122_v25 }
 0x2da   :  { %1136 = vrot.lane.b32.xlu0 %v1123_v5, %s1976_s14  ;;  %1130 = vrot.lane.b32.xlu1 %v1120_v8, %s1976_s14 }
 0x2de   :  { %1147 = vrot.lane.b32.xlu0 %v1118_v2, %s1977_s27  ;;  %1134 = vrot.lane.b32.xlu1 %v1122_v25, %s1976_s14 }
 0x2e2   :  { %1151 = vrot.lane.b32.xlu0 %v1120_v8, %s1977_s27  ;;  %1145 = vrot.lane.b32.xlu1 %v2450_v1, %s1977_s27  ;;  %v1171_v8 = vld [vmem:[%s2790_s5 + $0x28] sm:$0xff] }
 0x2e6   :  { %1155 = vrot.lane.b32.xlu0 %v1122_v25, %s1977_s27  ;;  %1149 = vrot.lane.b32.xlu1 %v1119_v43, %s1977_s27  ;;  %v1170_v25 = vld [vmem:[%s2790_s5 + $0x20] sm:$0xff] }
 0x2ea   :  { %1376 = vperm.xlu0 %1968, %v1372_v27   ;;  %1153 = vrot.lane.b32.xlu1 %v1121_v32, %s1977_s27  ;;  %v1173_v27 = vld [vmem:[%s2790_s5 + $0x38] sm:$0xff] }
 0x2ee   :  { %1157 = vrot.lane.b32.xlu1 %v1123_v5, %s1977_s27  ;;  %v1182_v5 = vld [vmem:[%s2790_s5 + $0x80] sm:$0xff] }
 0x2f2   :  { %1381 = vperm.xlu1 %1969, %v1373_v28   ;;  %v1189_v28 = vld [vmem:[%s2790_s5 + $0xb8] sm:$0xff] }
 0x344   :  { %v1129_v33 = vpop.permute.xlu0 %1128  ;;  %v1125_v34 = vpop.permute.xlu1 %1124 }
 0x345   :  { %v1138_v40 = vmul.f32 %v2254_v42, %v1125_v34  ;;  %v1140_v48 = vmul.f32 %v2254_v42, %v1129_v33  ;;  %v1175_v33 = vld [vmem:[%s2790_s5 + $0x48] sm:$0xff] }
 0x346   :  { %v1191_v34 = vld [vmem:[%s2790_s5 + $0xc8] sm:$0xff] }
 0x348   :  { %v1127_v38 = vpop.permute.xlu1 %1126  ;;  %v1133_v44 = vpop.permute.xlu0 %1132 }
 0x349   :  { %v1139_v41 = vmul.f32 %v2254_v42, %v1127_v38  ;;  %v1142_v7 = vmul.f32 %v2254_v42, %v1133_v44  ;;  %v1174_v38 = vld [vmem:[%s2790_s5 + $0x40] sm:$0xff]  ;;  %v1193_v44 = vld [vmem:[%s2790_s5 + $0xd8] sm:$0xff] }
 0x34b   :  { %v1911_v45 = vpack.c.bf16 %v1139_v41, %v1138_v40  ;;  %v1190_v40 = vld [vmem:[%s2790_s5 + $0xc0] sm:$0xff]  ;;  %v1177_v41 = vld [vmem:[%s2790_s5 + $0x58] sm:$0xff] }
 0x34c   :  { %v1131_v46 = vpop.permute.xlu1 %1130  ;;  %v1137_v51 = vpop.permute.xlu0 %1136 }
 0x34d   :  { %v1141_v49 = vmul.f32 %v2254_v42, %v1131_v46  ;;  %1912 = vmatpush1.bf16.msra.mxu0 %v1911_v45  ;;  %1951 = vmatpush1.bf16.msra.mxu1 %v1911_v45  ;;  %v1144_v54 = vmul.f32 %v2254_v42, %v1137_v51  ;;  %v1176_v45 = vld [vmem:[%s2790_s5 + $0x50] sm:$0xff] }
 0x34e   :  { %1913 = vmatprep.subr.bf16.mxu0 %v1978_v35  ;;  %1941 = vmatprep.subr.bf16.mxu1 %v1978_v35  ;;  %v1192_v46 = vld [vmem:[%s2790_s5 + $0xd0] sm:$0xff] }
 0x34f   :  { %v1914_v50 = vpack.c.bf16 %v1141_v49, %v1140_v48  ;;  %v1920_v58 = vpack.c.bf16 %v2450_v1, %v1144_v54  ;;  %v1179_v48 = vld [vmem:[%s2790_s5 + $0x68] sm:$0xff]  ;;  %v1178_v49 = vld [vmem:[%s2790_s5 + $0x60] sm:$0xff]  ;;  %v1180_v51 = vld [vmem:[%s2790_s5 + $0x70] sm:$0xff] }
 0x350   :  { %v1135_v52 = vpop.permute.xlu1 %1134 }
 0x351   :  { %v1143_v53 = vmul.f32 %v2254_v42, %v1135_v52  ;;  %1915 = vmatpush1.bf16.msra.mxu0 %v1914_v50  ;;  %1952 = vmatpush1.bf16.msra.mxu1 %v1914_v50  ;;  %v1148_v42 = vpop.permute.xlu0 %1147  ;;  %v1181_v50 = vld [vmem:[%s2790_s5 + $0x78] sm:$0xff] }
 0x352   :  { %1916 = vmatprep.subr.bf16.mxu0 %v1978_v35  ;;  %1942 = vmatprep.subr.bf16.mxu1 %v1978_v35  ;;  %v1160_v62 = vmul.f32 %v2266_v57, %v1148_v42 }
 0x353   :  { %v1917_v56 = vpack.c.bf16 %v1143_v53, %v1142_v7 }
 0x354   :  { %v1146_v30 = vpop.permute.xlu1 %1145 }
 0x355   :  { %1918 = vmatpush1.bf16.msra.mxu0 %v1917_v56  ;;  %1953 = vmatpush1.bf16.msra.mxu1 %v1917_v56  ;;  %v1159_v60 = vmul.f32 %v2266_v57, %v1146_v30  ;;  %v1152_v61 = vpop.permute.xlu0 %1151 }
 0x356   :  { %1919 = vmatprep.subr.bf16.mxu0 %v1978_v35  ;;  %1943 = vmatprep.subr.bf16.mxu1 %v1978_v35  ;;  %v1162_v24 = vmul.f32 %v2266_v57, %v1152_v61 }
 0x357   :  { %v1932_v63 = vpack.c.bf16 %v1160_v62, %v1159_v60 }
 0x358   :  { %v1150_v59 = vpop.permute.xlu1 %1149 }
 0x359   :  { %1921 = vmatpush1.bf16.msra.mxu0 %v1920_v58  ;;  %1954 = vmatpush1.bf16.msra.mxu1 %v1920_v58  ;;  %v1161_v55 = vmul.f32 %v2266_v57, %v1150_v59  ;;  %v1156_v47 = vpop.permute.xlu0 %1155 }
 0x35a   :  { %1922 = vmatprep.subr.bf16.mxu0 %v1978_v35  ;;  %1944 = vmatprep.subr.bf16.mxu1 %v1978_v35  ;;  %v1164_v0 = vmul.f32 %v2266_v57, %v1156_v47 }
 0x35b   :  { %v1935_v43 = vpack.c.bf16 %v1162_v24, %v1161_v55 }
 0x35c   :  { %v1154_v39 = vpop.permute.xlu1 %1153 }
 0x35d   :  { %1924 = vmatpush1.bf16.msra.mxu0 %v2455_v4  ;;  %1955 = vmatpush1.bf16.msra.mxu1 %v2455_v4  ;;  %v1163_v1 = vmul.f32 %v2266_v57, %v1154_v39  ;;  %v1166_v4 = vld [vmem:[%s2790_s5] sm:$0xff] }
 0x35e   :  { %1925 = vmatprep.subr.bf16.mxu0 %v1978_v35  ;;  %1945 = vmatprep.subr.bf16.mxu1 %v1978_v35 }
 0x35f   :  { %v1938_v32 = vpack.c.bf16 %v1164_v0, %v1163_v1 }
 0x360   :  { %v1158_v2 = vpop.permute.xlu1 %1157 }
 0x361   :  { %1927 = vmatpush1.bf16.msra.mxu0 %v2457_v23  ;;  %1956 = vmatpush1.bf16.msra.mxu1 %v2457_v23  ;;  %v1165_v3 = vmul.f32 %v2266_v57, %v1158_v2  ;;  %v1184_v57 = vld [vmem:[%s2790_s5 + $0x90] sm:$0xff]  ;;  %v1187_v23 = vld [vmem:[%s2790_s5 + $0xa8] sm:$0xff] }
 0x362   :  { %1928 = vmatprep.subr.bf16.mxu0 %v1978_v35  ;;  %1946 = vmatprep.subr.bf16.mxu1 %v1978_v35 }
 0x365   :  { %1930 = vmatpush1.bf16.msra.mxu0 %v2461_v26  ;;  %1957 = vmatpush1.bf16.msra.mxu1 %v2461_v26  ;;  %v1186_v26 = vld [vmem:[%s2790_s5 + $0xa0] sm:$0xff] }
 0x366   :  { %1931 = vmatprep.subr.bf16.mxu0 %v1978_v35  ;;  %1947 = vmatprep.subr.bf16.mxu1 %v1978_v35 }
 0x369   :  { %1933 = vmatpush1.bf16.msra.mxu0 %v1932_v63  ;;  %1958 = vmatpush1.bf16.msra.mxu1 %v1932_v63  ;;  %v2619_v52 = vpop.permute.xlu0 %1376 }
 0x36a   :  { %1934 = vmatprep.subr.bf16.mxu0 %v1978_v35  ;;  %1948 = vmatprep.subr.bf16.mxu1 %v1978_v35 }
 0x36d   :  { %1936 = vmatpush1.bf16.msra.mxu0 %v1935_v43  ;;  %1959 = vmatpush1.bf16.msra.mxu1 %v1935_v43 }
 0x36e   :  { %1937 = vmatprep.subr.bf16.mxu0 %v1978_v35  ;;  %1949 = vmatprep.subr.bf16.mxu1 %v1978_v35  ;;  %v1169_v35 = vld [vmem:[%s2790_s5 + $0x18] sm:$0xff] }
 0x371   :  { %1939 = vmatpush1.bf16.msra.mxu0 %v1938_v32  ;;  %1960 = vmatpush1.bf16.msra.mxu1 %v1938_v32  ;;  %v2627_v42 = vpop.permute.xlu1 %1381 }
 0x372   :  { %1277 = vmatprep.subr.mxu0 %v1980_v37  ;;  %1950 = vmatprep.subr.mxu1 %v1980_v37  ;;  %v1168_v37 = vld [vmem:[%s2790_s5 + $0x10] sm:$0xff] }
 0x375   :  { %1278 = vmatpush1.msra.mxu0 %v1165_v3  ;;  %1961 = vmatpush1.msra.mxu1 %v1165_v3 }
 0x376   :  { %1302 = vmatmul.mubr.f32.vlgmr.msra.gmra.mrb[22].mxu0 %v1166_v4  ;;  %1342 = vmatmul.mubr.f32.vlgmr.msra.gmra.mrb[20].mxu1 %v1182_v5 }
 0x377   :  { %1634 = vmatprep.mubr.msk.f32.mxu0 %vm1194_vm10, %v1169_v35  ;;  %1642 = vmatprep.mubr.msk.f32.mxu1 %vm1194_vm10, %v1185_v6 }
 0x37a   :  { %1307 = vmatmul.mubr.f32.gmra.mrb[24].mxu0 %v1168_v37  ;;  %1347 = vmatmul.mubr.f32.gmra.mrb[22].mxu1 %v1184_v57 }
 0x37b   :  { %1635 = vmatprep.mubr.msk.f32.mxu0 %vm1194_vm10, %v1171_v8  ;;  %1643 = vmatprep.mubr.msk.f32.mxu1 %vm1194_vm10, %v1187_v23 }
 0x37e   :  { %1312 = vmatmul.mubr.f32.gmra.mrb[26].mxu0 %v1170_v25  ;;  %1352 = vmatmul.mubr.f32.gmra.mrb[24].mxu1 %v1186_v26 }
 0x37f   :  { %1636 = vmatprep.mubr.msk.f32.mxu0 %vm1194_vm10, %v1173_v27  ;;  %1644 = vmatprep.mubr.msk.f32.mxu1 %vm1194_vm10, %v1189_v28 }
 0x382   :  { %1317 = vmatmul.mubr.f32.gmra.mrb[28].mxu0 %v1172_v29  ;;  %1357 = vmatmul.mubr.f32.gmra.mrb[26].mxu1 %v1188_v31 }
 0x383   :  { %1637 = vmatprep.mubr.msk.f32.mxu0 %vm1194_vm10, %v1175_v33  ;;  %1645 = vmatprep.mubr.msk.f32.mxu1 %vm1194_vm10, %v1191_v34 }
 0x386   :  { %1322 = vmatmul.mubr.f32.gmra.mrb[30].mxu0 %v1174_v38  ;;  %1362 = vmatmul.mubr.f32.gmra.mrb[28].mxu1 %v1190_v40 }
 0x387   :  { %1638 = vmatprep.mubr.msk.f32.mxu0 %vm1194_vm10, %v1177_v41  ;;  %1646 = vmatprep.mubr.msk.f32.mxu1 %vm1194_vm10, %v1193_v44 }
 0x38a   :  { %1327 = vmatmul.mubr.f32.gmra.mrb[32].mxu0 %v1176_v45  ;;  %1367 = vmatmul.mubr.f32.gmra.mrb[30].mxu1 %v1192_v46 }
 0x38b   :  { %1639 = vmatprep.mubr.msk.f32.mxu0 %vm1194_vm10, %v1179_v48 }
 0x38e   :  { %1332 = vmatmul.mubr.f32.gmra.mrb[34].mxu0 %v1178_v49 }
 0x38f   :  { %1640 = vmatprep.mubr.msk.f32.mxu0 %vm1194_vm10, %v1181_v50 }
 0x392   :  { %1337 = vmatmul.mubr.f32.gmra.mrb[36].mxu0 %v1180_v51 }
 0x449   :  { %v1303_v7 = vpop.f32.mrb[22].mxu0  ;;  %v1343_v53 = vpop.f32.mrb[20].mxu1 }
 0x44a   :  { %v2622_v54 = vadd.f32 %v2619_v52, %v1303_v7  ;;  %v2625_v56 = vadd.f32 %v2619_v52, %v1343_v53  ;;  %v1305_v58 = vpop.f32.mrb[23].mxu0  ;;  %v1345_v30 = vpop.f32.mrb[21].mxu1 }
 0x44c   :  { %v1406_v59 = vmul.f32 %v2411_v36, %v2625_v56  ;;  %v1398_v60 = vmul.f32 %v2411_v36, %v2622_v54 }
 0x44d   :  { %v1308_v61 = vpop.f32.mrb[24].mxu0  ;;  %v1348_v62 = vpop.f32.mrb[22].mxu1 }
 0x44e   :  { %v2634_v63 = vadd.f32 %v2627_v42, %v1308_v61  ;;  %v2637_v55 = vadd.f32 %v2627_v42, %v1348_v62  ;;  %1428 = vadd.xlane.f32.xlu1 %v1406_v59  ;;  %v1350_v39 = vpop.f32.mrb[23].mxu1  ;;  %1412 = vadd.xlane.f32.xlu0 %v1398_v60  ;;  %v1310_v24 = vpop.f32.mrb[25].mxu0  ;;  %v1452_v1 = vmul.f32 %v1398_v60, %v1398_v60 }
 0x44f   :  { %v1460_v4 = vmul.f32 %v1406_v59, %v1406_v59 }
 0x450   :  { %v1399_v47 = vmul.f32 %v2411_v36, %v2634_v63  ;;  %v1407_v43 = vmul.f32 %v2411_v36, %v2637_v55 }
 0x451   :  { %v1313_v0 = vpop.f32.mrb[26].mxu0  ;;  %v1353_v32 = vpop.f32.mrb[24].mxu1 }
 0x452   :  { %1430 = vadd.xlane.f32.xlu0 %v1407_v43  ;;  %1466 = vadd.xlane.f32.xlu1 %v1452_v1  ;;  %v1315_v2 = vpop.f32.mrb[27].mxu0  ;;  %v1355_v3 = vpop.f32.mrb[25].mxu1  ;;  %v1453_v5 = vmul.f32 %v1399_v47, %v1399_v47  ;;  %v2644_v8 = vadd.f32 %v2619_v52, %v1313_v0  ;;  %v2647_v23 = vadd.f32 %v2619_v52, %v1353_v32 }
 0x453   :  { %v1461_v25 = vmul.f32 %v1407_v43, %v1407_v43 }
 0x454   :  { %v1408_v33 = vmul.f32 %v2411_v36, %v2647_v23  ;;  %v1400_v34 = vmul.f32 %v2411_v36, %v2644_v8 }
 0x455   :  { %v1318_v35 = vpop.f32.mrb[28].mxu0  ;;  %v1358_v6 = vpop.f32.mrb[26].mxu1 }
 0x456   :  { %1482 = vadd.xlane.f32.xlu1 %v1460_v4  ;;  %1468 = vadd.xlane.f32.xlu0 %v1453_v5  ;;  %v1320_v37 = vpop.f32.mrb[29].mxu0  ;;  %v1360_v57 = vpop.f32.mrb[27].mxu1  ;;  %v2650_v31 = vadd.f32 %v2627_v42, %v1318_v35  ;;  %v2657_v45 = vadd.f32 %v2627_v42, %v1358_v6  ;;  %v1454_v48 = vmul.f32 %v1400_v34, %v1400_v34 }
 0x457   :  { %v1462_v3 = vmul.f32 %v1408_v33, %v1408_v33  ;;  %v74_v57 = vld [vmem:[%s2791_s2 + $0x8] sm:$0xff] }
 0x458   :  { %v1401_v49 = vmul.f32 %v2411_v36, %v2650_v31  ;;  %v1409_v53 = vmul.f32 %v2411_v36, %v2657_v45 }
 0x459   :  { %v1323_v26 = vpop.f32.mrb[30].mxu0  ;;  %v1363_v27 = vpop.f32.mrb[28].mxu1 }
 0x45a   :  { %1414 = vadd.xlane.f32.xlu1 %v1399_v47  ;;  %1484 = vadd.xlane.f32.xlu0 %v1461_v25  ;;  %v1325_v28 = vpop.f32.mrb[31].mxu0  ;;  %v1365_v29 = vpop.f32.mrb[29].mxu1  ;;  %v2660_v46 = vadd.f32 %v2619_v52, %v1323_v26  ;;  %v2665_v7 = vadd.f32 %v2619_v52, %v1363_v27  ;;  %v1455_v61 = vmul.f32 %v1401_v49, %v1401_v49 }
 0x45b   :  { %v1463_v6 = vmul.f32 %v1409_v53, %v1409_v53 }
 0x45c   :  { %v1402_v58 = vmul.f32 %v2411_v36, %v2660_v46  ;;  %v1410_v62 = vmul.f32 %v2411_v36, %v2665_v7 }
 0x45d   :  { %v1328_v38 = vpop.f32.mrb[32].mxu0  ;;  %v1368_v40 = vpop.f32.mrb[30].mxu1 }
 0x45e   :  { %1432 = vadd.xlane.f32.xlu1 %v1408_v33  ;;  %1416 = vadd.xlane.f32.xlu0 %v1400_v34  ;;  %v1330_v41 = vpop.f32.mrb[33].mxu0  ;;  %v1370_v44 = vpop.f32.mrb[31].mxu1  ;;  %v2672_v60 = vadd.f32 %v2627_v42, %v1328_v38  ;;  %v2677_v39 = vadd.f32 %v2627_v42, %v1368_v40  ;;  %v1456_v47 = vmul.f32 %v1402_v58, %v1402_v58 }
 0x45f   :  { %v1464_v5 = vmul.f32 %v1410_v62, %v1410_v62 }
 0x460   :  { %2797 = vst [vmem:[#allocation3_spill] sm:$0xff] %v2677_v39  ;;  %v1403_v43 = vmul.f32 %v2411_v36, %v2672_v60  ;;  %v1411_v1 = vmul.f32 %v2411_v36, %v2677_v39 }
 0x461   :  { %v1333_v50 = vpop.f32.mrb[34].mxu0 }
 0x462   :  { %1470 = vadd.xlane.f32.xlu1 %v1454_v48  ;;  %1418 = vadd.xlane.f32.xlu0 %v1401_v49  ;;  %v1335_v51 = vpop.f32.mrb[35].mxu0  ;;  %v2680_v24 = vadd.f32 %v2619_v52, %v1333_v50  ;;  %v1457_v2 = vmul.f32 %v1403_v43, %v1403_v43  ;;  %v1465_v37 = vmul.f32 %v1411_v1, %v1411_v1 }
 0x464   :  { %v1404_v0 = vmul.f32 %v2411_v36, %v2680_v24 }
 0x465   :  { %v1338_v30 = vpop.f32.mrb[36].mxu0 }
 0x466   :  { %1434 = vadd.xlane.f32.xlu0 %v1409_v53  ;;  %1420 = vadd.xlane.f32.xlu1 %v1402_v58  ;;  %v1340_v59 = vpop.f32.mrb[37].mxu0  ;;  %v2689_v32 = vadd.f32 %v2627_v42, %v1338_v30  ;;  %v1458_v52 = vmul.f32 %v1404_v0, %v1404_v0  ;;  %v73_v42 = vld [vmem:[%s2791_s2] sm:$0xff] }
 0x468   :  { %v1405_v4 = vmul.f32 %v2411_v36, %v2689_v32 }
 0x46a   :  { %1472 = vadd.xlane.f32.xlu0 %v1455_v61  ;;  %1436 = vadd.xlane.f32.xlu1 %v1410_v62  ;;  %v1459_v35 = vmul.f32 %v1405_v4, %v1405_v4 }
 0x46e   :  { %1474 = vadd.xlane.f32.xlu1 %v1456_v47  ;;  %1422 = vadd.xlane.f32.xlu0 %v1403_v43 }
 0x472   :  { %1438 = vadd.xlane.f32.xlu0 %v1411_v1  ;;  %1424 = vadd.xlane.f32.xlu1 %v1404_v0 }
 0x476   :  { %1476 = vadd.xlane.f32.xlu0 %v1457_v2  ;;  %1478 = vadd.xlane.f32.xlu1 %v1458_v52 }
 0x47a   :  { %1486 = vadd.xlane.f32.xlu1 %v1462_v3  ;;  %1426 = vadd.xlane.f32.xlu0 %v1405_v4 }
 0x47e   :  { %1490 = vadd.xlane.f32.xlu1 %v1464_v5  ;;  %1480 = vadd.xlane.f32.xlu0 %v1459_v35 }
 0x482   :  { %1488 = vadd.xlane.f32.xlu0 %v1463_v6 }
 0x486   :  { %1492 = vadd.xlane.f32.xlu0 %v1465_v37 }
 0x48f   :  { %77 = vperm.xlu1 %1969, %v73_v42  }
 0x493   :  { %82 = vperm.xlu1 %1969, %v74_v57  }
 0x4db   :  { %v1429_v36 = vpop.xlane.xlu1 %1428  ;;  %v1413_v25 = vpop.xlane.xlu0 %1412 }
 0x4df   :  { %v1431_v26 = vpop.xlane.xlu0 %1430  ;;  %v1467_v27 = vpop.xlane.xlu1 %1466 }
 0x4e3   :  { %v1483_v28 = vpop.xlane.xlu1 %1482  ;;  %v1469_v29 = vpop.xlane.xlu0 %1468 }
 0x4e7   :  { %v1415_v33 = vpop.xlane.xlu1 %1414  ;;  %v1485_v34 = vpop.xlane.xlu0 %1484 }
 0x4eb   :  { %v1433_v38 = vpop.xlane.xlu1 %1432  ;;  %v1417_v40 = vpop.xlane.xlu0 %1416 }
 0x4ec   :  { %v1440_v30 = vadd.f32 %v1417_v40, %v1413_v25 }
 0x4ef   :  { %v1471_v41 = vpop.xlane.xlu1 %1470  ;;  %v1419_v44 = vpop.xlane.xlu0 %1418 }
 0x4f0   :  { %v1494_v47 = vadd.f32 %v1471_v41, %v1467_v27  ;;  %v1446_v3 = vadd.f32 %v1419_v44, %v1415_v33 }
 0x4f3   :  { %v1435_v48 = vpop.xlane.xlu0 %1434  ;;  %v1421_v49 = vpop.xlane.xlu1 %1420 }
 0x4f4   :  { %v1441_v59 = vadd.f32 %v1440_v30, %v1421_v49 }
 0x4f7   :  { %v1473_v50 = vpop.xlane.xlu0 %1472  ;;  %v1437_v51 = vpop.xlane.xlu1 %1436 }
 0x4f8   :  { %v1500_v21 = vadd.f32 %v1473_v50, %v1469_v29 }
 0x4fb   :  { %v1475_v53 = vpop.xlane.xlu1 %1474  ;;  %v1423_v58 = vpop.xlane.xlu0 %1422 }
 0x4fc   :  { %v1495_v1 = vadd.f32 %v1494_v47, %v1475_v53  ;;  %v1447_v35 = vadd.f32 %v1446_v3, %v1423_v58 }
 0x4ff   :  { %v1439_v61 = vpop.xlane.xlu0 %1438  ;;  %v1425_v62 = vpop.xlane.xlu1 %1424 }
 0x500   :  { %v1442_v43 = vadd.f32 %v1441_v59, %v1425_v62 }
 0x502   :  { %v1443_v0 = vadd.f32 %v1442_v43, %v1429_v36 }
 0x503   :  { %v1477_v2 = vpop.xlane.xlu0 %1476  ;;  %v1479_v52 = vpop.xlane.xlu1 %1478 }
 0x504   :  { %v1444_v4 = vadd.f32 %v1443_v0, %v1433_v38  ;;  %v1496_v5 = vadd.f32 %v1495_v1, %v1479_v52  ;;  %v1501_v25 = vadd.f32 %v1500_v21, %v1477_v2 }
 0x506   :  { %v1445_v6 = vadd.f32 %v1444_v4, %v1437_v51  ;;  %v1497_v37 = vadd.f32 %v1496_v5, %v1483_v28  ;;  %v1522_v4 = vld [vmem:[%s2793_s10] sm:$0xff]  ;;  %v1523_v5 = vld [vmem:[%s2793_s10 + $0x8] sm:$0xff] }
 0x507   :  { %v1487_v42 = vpop.xlane.xlu1 %1486  ;;  %v1427_v57 = vpop.xlane.xlu0 %1426 }
 0x508   :  { %v1448_v39 = vadd.f32 %v1447_v35, %v1427_v57  ;;  %v1498_v40 = vadd.f32 %v1497_v37, %v1487_v42  ;;  %v1506_v30 = vmul.f32 0.004464286, %v1445_v6 }
 0x50a   :  { %v1449_v49 = vadd.f32 %v1448_v39, %v1431_v26  ;;  %v1510_v62 = vmul.f32 %v1506_v30, %v1506_v30 }
 0x50b   :  { %v1491_v27 = vpop.xlane.xlu1 %1490  ;;  %v1481_v41 = vpop.xlane.xlu0 %1480 }
 0x50c   :  { %v1450_v53 = vadd.f32 %v1449_v49, %v1435_v48  ;;  %v1499_v36 = vadd.f32 %v1498_v40, %v1491_v27  ;;  %v1502_v59 = vadd.f32 %v1501_v25, %v1481_v41  ;;  %v1514_v48 = vld [vmem:[%s2792_s9] sm:$0xff] }
 0x50e   :  { %v1508_v33 = vmul.f32 0.004464286, %v1499_v36  ;;  %v1451_v44 = vadd.f32 %v1450_v53, %v1439_v61  ;;  %v1503_v51 = vadd.f32 %v1502_v59, %v1485_v34  ;;  %v1515_v34 = vld [vmem:[%s2792_s9 + $0x8] sm:$0xff] }
 0x50f   :  { %v1489_v38 = vpop.xlane.xlu0 %1488  ;;  %v78_v42 = vpop.permute.xlu1 %77 }
 0x510   :  { %v1512_v58 = vsub.f32 %v1508_v33, %v1510_v62  ;;  %v1504_v29 = vadd.f32 %v1503_v51, %v1489_v38  ;;  %v1507_v50 = vmul.f32 0.004464286, %v1451_v44  ;;  %v159_v25 = vadd.f32 %v2392_v15, %v78_v42 }
 0x511   :  { %v240_v40 = vadd.f32 %v2382_v10, %v78_v42  ;;  %v321_v49 = vadd.f32 %v2398_v16, %v78_v42  ;;  %v402_v27 = vadd.f32 %v2386_v12, %v78_v42  ;;  %v483_v41 = vadd.f32 %v2402_v20, %v78_v42 }
 0x512   :  { %v1516_v28 = vadd.f32 1e-05, %v1512_v58  ;;  %v1511_v43 = vmul.f32 %v1507_v50, %v1507_v50  ;;  %v564_v53 = vadd.f32 %v2394_v17, %v78_v42  ;;  %v645_v36 = vadd.f32 %v2406_v22, %v78_v42 }
 0x513   :  { %v1493_v47 = vpop.xlane.xlu0 %1492  ;;  %v83_v57 = vpop.permute.xlu1 %82 }
 0x514   :  { %1972 = vrsqrt.f32 %v1516_v28  ;;  %v1505_v21 = vadd.f32 %v1504_v29, %v1493_v47  ;;  %v164_v59 = vadd.f32 %v2388_v13, %v83_v57  ;;  %v245_v62 = vadd.f32 %v2380_v9, %v83_v57 }
 0x515   :  { %v326_v33 = vadd.f32 %v2396_v18, %v83_v57  ;;  %v407_v15 = vadd.f32 %v2384_v11, %v83_v57  ;;  %v488_v16 = vadd.f32 %v2400_v19, %v83_v57  ;;  %v569_v38 = vadd.f32 %v2390_v14, %v83_v57 }
 0x516   :  { %v1509_v39 = vmul.f32 0.004464286, %v1505_v21 }
 0x518   :  { %v1513_v26 = vsub.f32 %v1509_v39, %v1511_v43 }
 0x51a   :  { %v1517_v1 = vadd.f32 1e-05, %v1513_v26 }
 0x51c   :  { %1974 = vrsqrt.f32 %v1517_v1 }
 0x51e   :  { %v1973_v0 = vpop.eup %1972 }
 0x51f   :  { %v1520_v2 = vmul.f32 %v1973_v0, %v1514_v48 }
 0x521   :  { %1530 = vperm.xlu1 %1969, %v1520_v2   ;;  %v1524_v3 = vmul.f32 %v1520_v2, %v1506_v30  ;;  %v2799_v2 = vld [vmem:[#allocation2_spill] sm:$0xff] }
 0x523   :  { %v1526_v6 = vsub.f32 %v1522_v4, %v1524_v3 }
 0x526   :  { %v1975_v61 = vpop.eup %1974 }
 0x527   :  { %v1521_v52 = vmul.f32 %v1975_v61, %v1515_v34  ;;  %v650_v34 = vadd.f32 %v2799_v2, %v83_v57 }
 0x529   :  { %1535 = vperm.xlu0 %1968, %v1521_v52   ;;  %v1525_v35 = vmul.f32 %v1521_v52, %v1507_v50 }
 0x52b   :  { %v1527_v37 = vsub.f32 %v1523_v5, %v1525_v35 }
 0x52d   :  { %1554 = vperm.xlu0 %1968, %v1526_v6   ;;  %1559 = vperm.xlu1 %1969, %v1527_v37  }
 0x5a0   :  { %v1531_v30 = vpop.permute.xlu1 %1530 }
 0x5a1   :  { %v1538_v12 = vmul.f32 %v1531_v30, %v2622_v54  ;;  %v1540_v20 = vmul.f32 %v1531_v30, %v2644_v8  ;;  %v1542_v17 = vmul.f32 %v1531_v30, %v2660_v46  ;;  %v1544_v22 = vmul.f32 %v1531_v30, %v2680_v24  ;;  %v2798_v24 = vld [vmem:[#allocation3_spill] sm:$0xff] }
 0x5a2   :  { %v1546_v13 = vmul.f32 %v1531_v30, %v2625_v56  ;;  %v1548_v9 = vmul.f32 %v1531_v30, %v2647_v23  ;;  %v1550_v18 = vmul.f32 %v1531_v30, %v2665_v7 }
 0x5a8   :  { %v1536_v10 = vpop.permute.xlu0 %1535 }
 0x5a9   :  { %v1539_v11 = vmul.f32 %v1536_v10, %v2634_v63  ;;  %v1541_v19 = vmul.f32 %v1536_v10, %v2650_v31  ;;  %v1543_v14 = vmul.f32 %v1536_v10, %v2672_v60  ;;  %v1545_v54 = vmul.f32 %v1536_v10, %v2689_v32 }
 0x5aa   :  { %v1547_v8 = vmul.f32 %v1536_v10, %v2637_v55  ;;  %v1549_v46 = vmul.f32 %v1536_v10, %v2657_v45  ;;  %v1551_v58 = vmul.f32 %v1536_v10, %v2798_v24 }
 0x5ac   :  { %v1555_v44 = vpop.permute.xlu0 %1554  ;;  %v1560_v56 = vpop.permute.xlu1 %1559 }
 0x5ad   :  { %v1562_v51 = vadd.f32 %v1555_v44, %v1538_v12  ;;  %v1564_v23 = vadd.f32 %v1555_v44, %v1540_v20  ;;  %v1566_v28 = vadd.f32 %v1555_v44, %v1542_v17  ;;  %v1568_v7 = vadd.f32 %v1555_v44, %v1544_v22 }
 0x5ae   :  { %v1570_v47 = vadd.f32 %v1555_v44, %v1546_v13  ;;  %v1572_v63 = vadd.f32 %v1555_v44, %v1548_v9  ;;  %v1574_v29 = vadd.f32 %v1555_v44, %v1550_v18  ;;  %v1563_v31 = vadd.f32 %v1560_v56, %v1539_v11 }
 0x5af   :  { %v1576_v50 = vadd.f32 %v1562_v51, %v159_v25  ;;  %v1578_v60 = vadd.f32 %v1564_v23, %v240_v40  ;;  %v1580_v21 = vadd.f32 %v1566_v28, %v321_v49  ;;  %v1582_v43 = vadd.f32 %v1568_v7, %v402_v27 }
 0x5b0   :  { %v1584_v32 = vadd.f32 %v1570_v47, %v483_v41  ;;  %v1586_v39 = vadd.f32 %v1572_v63, %v564_v53  ;;  %v1588_v55 = vadd.f32 %v1574_v29, %v645_v36  ;;  %v1565_v26 = vadd.f32 %v1560_v56, %v1541_v19 }
 0x5b1   :  { %1590 = vst [vmem:[%s2794_s13] sm:$0xff] %v1576_v50  ;;  %1592 = vst [vmem:[%s2794_s13 + $0x10] sm:$0xff] %v1578_v60  ;;  %v1567_v45 = vadd.f32 %v1560_v56, %v1543_v14  ;;  %v1569_v1 = vadd.f32 %v1560_v56, %v1545_v54  ;;  %v1571_v48 = vadd.f32 %v1560_v56, %v1547_v8 }
 0x5b2   :  { %1594 = vst [vmem:[%s2794_s13 + $0x20] sm:$0xff] %v1580_v21  ;;  %1596 = vst [vmem:[%s2794_s13 + $0x30] sm:$0xff] %v1582_v43  ;;  %v1573_v0 = vadd.f32 %v1560_v56, %v1549_v46  ;;  %v1575_v61 = vadd.f32 %v1560_v56, %v1551_v58  ;;  %v1577_v52 = vadd.f32 %v1563_v31, %v164_v59 }
 0x5b3   :  { %1598 = vst [vmem:[%s2794_s13 + $0x40] sm:$0xff] %v1584_v32  ;;  %1600 = vst [vmem:[%s2794_s13 + $0x50] sm:$0xff] %v1586_v39  ;;  %v1579_v3 = vadd.f32 %v1565_v26, %v245_v62  ;;  %v1581_v4 = vadd.f32 %v1567_v45, %v326_v33  ;;  %v1583_v5 = vadd.f32 %v1569_v1, %v407_v15 }
 0x5b4   :  { %1602 = vst [vmem:[%s2794_s13 + $0x60] sm:$0xff] %v1588_v55  ;;  %v1585_v35 = vadd.f32 %v1571_v48, %v488_v16  ;;  %v1587_v6 = vadd.f32 %v1573_v0, %v569_v38  ;;  %v1589_v37 = vadd.f32 %v1575_v61, %v650_v34  ;;  %1591 = vst [vmem:[%s2794_s13 + $0x8] sm:$0xff] %v1577_v52 }
 0x5b5   :  { %1593 = vst [vmem:[%s2794_s13 + $0x18] sm:$0xff] %v1579_v3  ;;  %1595 = vst [vmem:[%s2794_s13 + $0x28] sm:$0xff] %v1581_v4 }
 0x5b6   :  { %1597 = vst [vmem:[%s2794_s13 + $0x38] sm:$0xff] %v1583_v5  ;;  %1599 = vst [vmem:[%s2794_s13 + $0x48] sm:$0xff] %v1585_v35 }
 0x5b7   :  { %1601 = vst [vmem:[%s2794_s13 + $0x58] sm:$0xff] %v1587_v6  ;;  %1603 = vst [vmem:[%s2794_s13 + $0x68] sm:$0xff] %v1589_v37 }

</bundles_post_ra>
